<compile_context>
chip_gen: v6e
topology: v6e:2x2x1
jax: 0.10.0
libtpu: 0.0.40
codegen_flags: <defaults>
</compile_context>

<pallas_src>
import functools
import math

import jax
import jax.numpy as jnp
from jax.experimental import pallas as pl
from jax.experimental.pallas import tpu as pltpu

LANE = 128


# ---------------------------------------------------------------------------
# Fused forward kernel (everything VMEM-resident)
# ---------------------------------------------------------------------------

def _dgc_fused_kernel(*refs, n_gcn, n_clus_h, n_rec_h, n_class):
    it = iter(refs)
    a_ref, x_ref = next(it), next(it)
    gcn = [(next(it), next(it)) for _ in range(n_gcn)]
    clus_h = [(next(it), next(it)) for _ in range(n_clus_h)]
    clus_out_w, clus_out_b = next(it), next(it)
    rec_h = [(next(it), next(it)) for _ in range(n_rec_h)]
    rec_out_w, rec_out_b = next(it), next(it)
    xc_ref, xr_ref, xemb_ref = next(it), next(it), next(it)

    mxu_dtype = x_ref.dtype                      # bf16 operands for the MXU

    a = a_ref[...]
    h = x_ref[...]
    h_f32 = h.astype(jnp.float32)

    # --- GCN encoder: h <- tanh(A_hat @ (h @ W) + b) ---
    for w_ref, b_ref in gcn:
        xw = jnp.dot(h, w_ref[...], preferred_element_type=jnp.float32)
        y = jnp.dot(a, xw.astype(mxu_dtype), preferred_element_type=jnp.float32)
        h_f32 = jnp.tanh(y + b_ref[...])         # f32 elementwise (v5e-safe EUP path)
        h = h_f32.astype(mxu_dtype)
    xemb_ref[...] = h_f32                        # shared embedding output

    # --- clustering head (BatchNorm already folded into W/b) ---
    c = h
    for w_ref, b_ref in clus_h:
        y = jnp.dot(c, w_ref[...], preferred_element_type=jnp.float32) + b_ref[...]
        c = jnp.maximum(y, 0.0).astype(mxu_dtype)
    logits = jnp.dot(c, clus_out_w[...], preferred_element_type=jnp.float32) + clus_out_b[...]
    col = jax.lax.broadcasted_iota(jnp.int32, logits.shape, 1)
    logits = jnp.where(col < n_class, logits, -1e30)   # keep lane padding out of the softmax
    m = jnp.max(logits, axis=1, keepdims=True)
    e = jnp.exp(logits - m)
    denom = jnp.sum(e, axis=1, keepdims=True)
    xc_ref[...] = e * pl.reciprocal(denom, approx=True)

    # --- reconstruction head (Dropout = identity in eval mode) ---
    r = h
    for w_ref, b_ref in rec_h:
        y = jnp.dot(r, w_ref[...], preferred_element_type=jnp.float32) + b_ref[...]
        r = jnp.maximum(y, 0.0).astype(mxu_dtype)
    xr_ref[...] = jnp.dot(r, rec_out_w[...], preferred_element_type=jnp.float32) + rec_out_b[...]


# ---------------------------------------------------------------------------
# Parameter init (PyTorch-like), BN folding, lane padding
# ---------------------------------------------------------------------------

def _rup(v, m=LANE):
    return ((v + m - 1) // m) * m


def _pad2(a, rows, cols):
    r, c = a.shape
    return jnp.pad(a, ((0, rows - r), (0, cols - c)))


def _init_linear(key, d_in, d_out):
    kw, kb = jax.random.split(key)
    bound = 1.0 / math.sqrt(d_in)
    w = jax.random.uniform(kw, (d_in, d_out), jnp.float32, -bound, bound)
    b = jax.random.uniform(kb, (1, d_out), jnp.float32, -bound, bound)
    return w, b


def make_params(key, n_feat, n_hid, n_class):
    """Raw (unpadded, f32) parameters matching the PyTorch module."""
    gcn_dims, clus_dims, rec_dims = n_hid["gcn"], n_hid["clustering"], n_hid["reconstruct"]
    params = {"gcn": [], "clus_hidden": [], "rec_hidden": []}

    dims = [n_feat] + list(gcn_dims)
    for i in range(len(dims) - 1):
        key, sub = jax.random.split(key)
        params["gcn"].append(_init_linear(sub, dims[i], dims[i + 1]))

    dims = [gcn_dims[-1]] + list(clus_dims)
    for i in range(len(dims) - 1):
        key, sub, k1, k2, k3, k4 = jax.random.split(key, 6)
        w, b = _init_linear(sub, dims[i], dims[i + 1])
        d = dims[i + 1]
        gamma = jax.random.uniform(k1, (1, d), jnp.float32, 0.5, 1.5)
        beta = 0.1 * jax.random.normal(k2, (1, d), jnp.float32)
        rmean = 0.1 * jax.random.normal(k3, (1, d), jnp.float32)
        rvar = jax.random.uniform(k4, (1, d), jnp.float32, 0.5, 1.5)
        params["clus_hidden"].append((w, b, gamma, beta, rmean, rvar))
    key, sub = jax.random.split(key)
    params["clus_out"] = _init_linear(sub, dims[-1], n_class)

    dims = [gcn_dims[-1]] + list(rec_dims)
    for i in range(len(dims) - 1):
        key, sub = jax.random.split(key)
        params["rec_hidden"].append(_init_linear(sub, dims[i], dims[i + 1]))
    key, sub = jax.random.split(key)
    params["rec_out"] = _init_linear(sub, dims[-1], n_feat)
    return params


def _prep_linear(w, b):
    din, dout = w.shape
    wp = _pad2(w, _rup(din), _rup(dout)).astype(jnp.bfloat16)   # bf16 MXU operand
    bp = _pad2(b, 1, _rup(dout)).astype(jnp.float32)            # f32 bias
    return wp, bp


def prepare_params(raw):
    """Fold eval-mode BatchNorm into the Linear, pad every dim to 128 lanes, cast W to bf16."""
    prep = {"gcn": [], "clus_hidden": [], "rec_hidden": []}
    for w, b in raw["gcn"]:
        prep["gcn"].append(_prep_linear(w, b))
    for w, b, g, be, rm, rv in raw["clus_hidden"]:
        scale = g * jax.lax.rsqrt(rv + 1e-5)                    # (1, dout)
        prep["clus_hidden"].append(_prep_linear(w * scale, (b - rm) * scale + be))
    prep["clus_out"] = _prep_linear(*raw["clus_out"])
    for w, b in raw["rec_hidden"]:
        prep["rec_hidden"].append(_prep_linear(w, b))
    prep["rec_out"] = _prep_linear(*raw["rec_out"])
    prep["dims"] = {
        "n_class": raw["clus_out"][0].shape[1],
        "gcn_out": raw["gcn"][-1][0].shape[1],
        "n_feat_out": raw["rec_out"][0].shape[1],
    }
    return prep


def normalized_adjacency(edge_index, n_nodes):
    """Dense D^{-1/2}(A + I)D^{-1/2} from a [2, E] edge_index (treated undirected)."""
    src, dst = edge_index[0], edge_index[1]
    a = jnp.zeros((n_nodes, n_nodes), jnp.float32)
    a = a.at[src, dst].set(1.0)
    a = a.at[dst, src].set(1.0)
    a = jnp.maximum(a, jnp.eye(n_nodes, dtype=jnp.float32))     # self-loops
    deg = jnp.sum(a, axis=1)
    d_inv_sqrt = jax.lax.rsqrt(deg)
    return a * d_inv_sqrt[:, None] * d_inv_sqrt[None, :]


# ---------------------------------------------------------------------------
# Wrapper: single fused pallas_call
# ---------------------------------------------------------------------------

def _cost_estimate(np_, prep, flat_inputs, out_shape):
    flops = 0
    transcendentals = 0
    for w, _ in prep["gcn"]:
        din, dout = w.shape
        flops += 2 * np_ * din * dout + 2 * np_ * np_ * dout
        transcendentals += np_ * dout                           # tanh
    for w, _ in (prep["clus_hidden"] + [prep["clus_out"]]
                 + prep["rec_hidden"] + [prep["rec_out"]]):
        din, dout = w.shape
        flops += 2 * np_ * din * dout
    cp = prep["clus_out"][0].shape[1]
    transcendentals += np_ * cp + np_                           # softmax exp + reciprocal
    bytes_accessed = sum(int(a.size) * a.dtype.itemsize for a in flat_inputs)
    bytes_accessed += sum(math.prod(s.shape) * s.dtype.itemsize for s in out_shape)
    return pl.CostEstimate(flops=int(flops), transcendentals=int(transcendentals),
                           bytes_accessed=int(bytes_accessed))


def dgc_forward(prep, x, a_hat):
    assert len(prep["gcn"]) >= 1
    n, n_feat = x.shape
    dims = prep["dims"]
    np_ = _rup(n)
    fp = _rup(n_feat)
    cp = prep["clus_out"][0].shape[1]
    rp = prep["rec_out"][0].shape[1]
    gp = prep["gcn"][-1][0].shape[1]

    a_p = _pad2(a_hat, np_, np_).astype(jnp.bfloat16)
    x_p = _pad2(x, np_, fp).astype(jnp.bfloat16)

    flat_inputs = [a_p, x_p]
    for w, b in prep["gcn"]:
        flat_inputs += [w, b]
    for w, b in prep["clus_hidden"]:
        flat_inputs += [w, b]
    flat_inputs += list(prep["clus_out"])
    for w, b in prep["rec_hidden"]:
        flat_inputs += [w, b]
    flat_inputs += list(prep["rec_out"])

    out_shape = (
        jax.ShapeDtypeStruct((np_, cp), jnp.float32),   # clustering softmax
        jax.ShapeDtypeStruct((np_, rp), jnp.float32),   # reconstruction
        jax.ShapeDtypeStruct((np_, gp), jnp.float32),   # shared embedding x
    )

    kernel = functools.partial(
        _dgc_fused_kernel,
        n_gcn=len(prep["gcn"]),
        n_clus_h=len(prep["clus_hidden"]),
        n_rec_h=len(prep["rec_hidden"]),
        n_class=dims["n_class"],
    )

    vmem_spec = pl.BlockSpec(memory_space=pltpu.MemorySpace.VMEM)
    x_c_p, x_r_p, x_emb_p = pl.pallas_call(
        kernel,
        out_shape=out_shape,
        in_specs=[vmem_spec] * len(flat_inputs),
        out_specs=(vmem_spec, vmem_spec, vmem_spec),
        compiler_params=pltpu.CompilerParams(vmem_limit_bytes=32 * 1024 * 1024),
        cost_estimate=_cost_estimate(np_, prep, flat_inputs, out_shape),
    )(*flat_inputs)

    x_c = x_c_p[:n, :dims["n_class"]]
    x_r = x_r_p[:n, :dims["n_feat_out"]]
    x_emb = x_emb_p[:n, :dims["gcn_out"]]
    return [x_c, x_r], x_emb


# ---------------------------------------------------------------------------
# Pure-JAX reference (f32, unfolded BN) for correctness checking
# ---------------------------------------------------------------------------

def dgc_reference(raw, x, a_hat):
    h = x
    for w, b in raw["gcn"]:
        h = jnp.tanh(a_hat @ (h @ w) + b)
    x_c = h
    for w, b, g, be, rm, rv in raw["clus_hidden"]:
        y = x_c @ w + b
        y = (y - rm) * jax.lax.rsqrt(rv + 1e-5) * g + be
        x_c = jnp.maximum(y, 0.0)
    w, b = raw["clus_out"]
    x_c = jax.nn.softmax(x_c @ w + b, axis=1)
    x_r = h
    for w, b in raw["rec_hidden"]:
        x_r = jnp.maximum(x_r @ w + b, 0.0)
    w, b = raw["rec_out"]
    x_r = x_r @ w + b
    return x_c, x_r, h


if __name__ == "__main__":
    key = jax.random.PRNGKey(0)

    # Small, module-consistent shapes
    n_nodes = 16
    n_feat = 32
    n_hid = {"gcn": [32, 16], "clustering": [16, 8], "reconstruct": [16, 8]}
    n_class = 4
    n_edges = 40

    key, kx, ke, kp = jax.random.split(key, 4)
    x = jax.random.normal(kx, (n_nodes, n_feat), jnp.float32)
    edge_index = jax.random.randint(ke, (2, n_edges), 0, n_nodes, dtype=jnp.int32)

    raw_params = make_params(kp, n_feat, n_hid, n_class)
    a_hat = normalized_adjacency(edge_index, n_nodes)
    prep = prepare_params(raw_params)

    (x_c, x_r), x_emb = dgc_forward(prep, x, a_hat)
    jax.block_until_ready((x_c, x_r, x_emb))

    assert x_c.shape == (n_nodes, n_class)
    assert x_r.shape == (n_nodes, n_feat)
    assert x_emb.shape == (n_nodes, n_hid["gcn"][-1])

    # softmax rows sum to 1 (loose tol: EUP approximate reciprocal)
    assert bool(jnp.allclose(jnp.sum(x_c, axis=1), 1.0, atol=5e-3))

    # compare against pure-JAX f32 reference (loose tol: bf16 MXU operands)
    rc, rr, re = dgc_reference(raw_params, x, a_hat)
    assert bool(jnp.allclose(x_emb, re, atol=7.5e-2, rtol=7.5e-2))
    assert bool(jnp.allclose(x_c, rc, atol=7.5e-2, rtol=7.5e-2))
    assert bool(jnp.allclose(x_r, rr, atol=7.5e-2, rtol=7.5e-2))

    print("KERNEL_OK")
</pallas_src>

<mosaic_0001>
module attributes {stable_mosaic.version = 11 : i64} {
  func.func @_dgc_fused_kernel(%arg0: memref<128x128xbf16, #tpu.memory_space<vmem>>, %arg1: memref<128x128xbf16, #tpu.memory_space<vmem>>, %arg2: memref<128x128xbf16, #tpu.memory_space<vmem>>, %arg3: memref<1x128xf32, #tpu.memory_space<vmem>>, %arg4: memref<128x128xbf16, #tpu.memory_space<vmem>>, %arg5: memref<1x128xf32, #tpu.memory_space<vmem>>, %arg6: memref<128x128xbf16, #tpu.memory_space<vmem>>, %arg7: memref<1x128xf32, #tpu.memory_space<vmem>>, %arg8: memref<128x128xbf16, #tpu.memory_space<vmem>>, %arg9: memref<1x128xf32, #tpu.memory_space<vmem>>, %arg10: memref<128x128xbf16, #tpu.memory_space<vmem>>, %arg11: memref<1x128xf32, #tpu.memory_space<vmem>>, %arg12: memref<128x128xbf16, #tpu.memory_space<vmem>>, %arg13: memref<1x128xf32, #tpu.memory_space<vmem>>, %arg14: memref<128x128xbf16, #tpu.memory_space<vmem>>, %arg15: memref<1x128xf32, #tpu.memory_space<vmem>>, %arg16: memref<128x128xbf16, #tpu.memory_space<vmem>>, %arg17: memref<1x128xf32, #tpu.memory_space<vmem>>, %arg18: memref<128x128xf32, #tpu.memory_space<vmem>>, %arg19: memref<128x128xf32, #tpu.memory_space<vmem>>, %arg20: memref<128x128xf32, #tpu.memory_space<vmem>>) attributes {dimension_semantics = [], scalar_prefetch = 0 : i64, scratch_operands = 0 : i64, tpu.core_type = #tpu.core_type<tc>} {
    %c0 = arith.constant 0 : index
    %c0_0 = arith.constant 0 : index
    %0 = vector.load %arg0[%c0, %c0_0] : memref<128x128xbf16, #tpu.memory_space<vmem>>, vector<128x128xbf16>
    %c0_1 = arith.constant 0 : index
    %c0_2 = arith.constant 0 : index
    %1 = vector.load %arg1[%c0_1, %c0_2] : memref<128x128xbf16, #tpu.memory_space<vmem>>, vector<128x128xbf16>
    %c0_3 = arith.constant 0 : index
    %c0_4 = arith.constant 0 : index
    %2 = vector.load %arg2[%c0_3, %c0_4] : memref<128x128xbf16, #tpu.memory_space<vmem>>, vector<128x128xbf16>
    %cst = arith.constant dense<0.000000e+00> : vector<128x128xf32>
    %3 = tpu.matmul %1, %2, %cst {dimension_numbers = #tpu.dot_dimension_numbers<[1], [0], [0], [1], [0, 0, 1, 1], [], []>} : vector<128x128xbf16>, vector<128x128xbf16>, vector<128x128xf32> -> vector<128x128xf32>
    %4 = arith.truncf %3 : vector<128x128xf32> to vector<128x128xbf16>
    %cst_5 = arith.constant dense<0.000000e+00> : vector<128x128xf32>
    %5 = tpu.matmul %0, %4, %cst_5 {dimension_numbers = #tpu.dot_dimension_numbers<[1], [0], [0], [1], [0, 0, 1, 1], [], []>} : vector<128x128xbf16>, vector<128x128xbf16>, vector<128x128xf32> -> vector<128x128xf32>
    %c0_6 = arith.constant 0 : index
    %c0_7 = arith.constant 0 : index
    %6 = vector.load %arg3[%c0_6, %c0_7] : memref<1x128xf32, #tpu.memory_space<vmem>>, vector<1x128xf32>
    %7 = vector.broadcast %6 : vector<1x128xf32> to vector<128x128xf32>
    %8 = arith.addf %5, %7 : vector<128x128xf32>
    %9 = math.tanh %8 : vector<128x128xf32>
    %10 = arith.truncf %9 : vector<128x128xf32> to vector<128x128xbf16>
    %c0_8 = arith.constant 0 : index
    %c0_9 = arith.constant 0 : index
    %11 = vector.load %arg4[%c0_8, %c0_9] : memref<128x128xbf16, #tpu.memory_space<vmem>>, vector<128x128xbf16>
    %cst_10 = arith.constant dense<0.000000e+00> : vector<128x128xf32>
    %12 = tpu.matmul %10, %11, %cst_10 {dimension_numbers = #tpu.dot_dimension_numbers<[1], [0], [0], [1], [0, 0, 1, 1], [], []>} : vector<128x128xbf16>, vector<128x128xbf16>, vector<128x128xf32> -> vector<128x128xf32>
    %13 = arith.truncf %12 : vector<128x128xf32> to vector<128x128xbf16>
    %cst_11 = arith.constant dense<0.000000e+00> : vector<128x128xf32>
    %14 = tpu.matmul %0, %13, %cst_11 {dimension_numbers = #tpu.dot_dimension_numbers<[1], [0], [0], [1], [0, 0, 1, 1], [], []>} : vector<128x128xbf16>, vector<128x128xbf16>, vector<128x128xf32> -> vector<128x128xf32>
    %c0_12 = arith.constant 0 : index
    %c0_13 = arith.constant 0 : index
    %15 = vector.load %arg5[%c0_12, %c0_13] : memref<1x128xf32, #tpu.memory_space<vmem>>, vector<1x128xf32>
    %16 = vector.broadcast %15 : vector<1x128xf32> to vector<128x128xf32>
    %17 = arith.addf %14, %16 : vector<128x128xf32>
    %18 = math.tanh %17 : vector<128x128xf32>
    %19 = arith.truncf %18 : vector<128x128xf32> to vector<128x128xbf16>
    %c0_14 = arith.constant 0 : index
    %c0_15 = arith.constant 0 : index
    %20 = vector.load %arg20[%c0_14, %c0_15] : memref<128x128xf32, #tpu.memory_space<vmem>>, vector<128x128xf32>
    tpu.vector_store %arg20[%c0_14, %c0_15], %18 {strides = array<i32>} : memref<128x128xf32, #tpu.memory_space<vmem>>, vector<128x128xf32>,
    %c0_16 = arith.constant 0 : index
    %c0_17 = arith.constant 0 : index
    %21 = vector.load %arg6[%c0_16, %c0_17] : memref<128x128xbf16, #tpu.memory_space<vmem>>, vector<128x128xbf16>
    %cst_18 = arith.constant dense<0.000000e+00> : vector<128x128xf32>
    %22 = tpu.matmul %19, %21, %cst_18 {dimension_numbers = #tpu.dot_dimension_numbers<[1], [0], [0], [1], [0, 0, 1, 1], [], []>} : vector<128x128xbf16>, vector<128x128xbf16>, vector<128x128xf32> -> vector<128x128xf32>
    %c0_19 = arith.constant 0 : index
    %c0_20 = arith.constant 0 : index
    %23 = vector.load %arg7[%c0_19, %c0_20] : memref<1x128xf32, #tpu.memory_space<vmem>>, vector<1x128xf32>
    %24 = vector.broadcast %23 : vector<1x128xf32> to vector<128x128xf32>
    %25 = arith.addf %22, %24 : vector<128x128xf32>
    %cst_21 = arith.constant 0.000000e+00 : f32
    %26 = vector.broadcast %cst_21 : f32 to vector<128x128xf32>
    %27 = arith.maximumf %25, %26 : vector<128x128xf32>
    %28 = arith.truncf %27 : vector<128x128xf32> to vector<128x128xbf16>
    %c0_22 = arith.constant 0 : index
    %c0_23 = arith.constant 0 : index
    %29 = vector.load %arg8[%c0_22, %c0_23] : memref<128x128xbf16, #tpu.memory_space<vmem>>, vector<128x128xbf16>
    %cst_24 = arith.constant dense<0.000000e+00> : vector<128x128xf32>
    %30 = tpu.matmul %28, %29, %cst_24 {dimension_numbers = #tpu.dot_dimension_numbers<[1], [0], [0], [1], [0, 0, 1, 1], [], []>} : vector<128x128xbf16>, vector<128x128xbf16>, vector<128x128xf32> -> vector<128x128xf32>
    %c0_25 = arith.constant 0 : index
    %c0_26 = arith.constant 0 : index
    %31 = vector.load %arg9[%c0_25, %c0_26] : memref<1x128xf32, #tpu.memory_space<vmem>>, vector<1x128xf32>
    %32 = vector.broadcast %31 : vector<1x128xf32> to vector<128x128xf32>
    %33 = arith.addf %30, %32 : vector<128x128xf32>
    %cst_27 = arith.constant 0.000000e+00 : f32
    %34 = vector.broadcast %cst_27 : f32 to vector<128x128xf32>
    %35 = arith.maximumf %33, %34 : vector<128x128xf32>
    %36 = arith.truncf %35 : vector<128x128xf32> to vector<128x128xbf16>
    %c0_28 = arith.constant 0 : index
    %c0_29 = arith.constant 0 : index
    %37 = vector.load %arg10[%c0_28, %c0_29] : memref<128x128xbf16, #tpu.memory_space<vmem>>, vector<128x128xbf16>
    %cst_30 = arith.constant dense<0.000000e+00> : vector<128x128xf32>
    %38 = tpu.matmul %36, %37, %cst_30 {dimension_numbers = #tpu.dot_dimension_numbers<[1], [0], [0], [1], [0, 0, 1, 1], [], []>} : vector<128x128xbf16>, vector<128x128xbf16>, vector<128x128xf32> -> vector<128x128xf32>
    %c0_31 = arith.constant 0 : index
    %c0_32 = arith.constant 0 : index
    %39 = vector.load %arg11[%c0_31, %c0_32] : memref<1x128xf32, #tpu.memory_space<vmem>>, vector<1x128xf32>
    %40 = vector.broadcast %39 : vector<1x128xf32> to vector<128x128xf32>
    %41 = arith.addf %38, %40 : vector<128x128xf32>
    %42 = tpu.iota {dimensions = array<i32: 1>} : vector<128x128xi32>
    %c4_i32 = arith.constant 4 : i32
    %43 = vector.broadcast %c4_i32 : i32 to vector<128x128xi32>
    %44 = arith.cmpi slt, %42, %43 : vector<128x128xi32>
    %cst_33 = arith.constant -1.000000e+30 : f32
    %45 = vector.broadcast %cst_33 : f32 to vector<128x128xf32>
    %46 = arith.select %44, %41, %45 : vector<128x128xi1>, vector<128x128xf32>
    %cst_34 = arith.constant dense<0xFF800000> : vector<128xf32>
    %47 = vector.multi_reduction <maximumf>, %46, %cst_34 [1] : vector<128x128xf32> to vector<128xf32>
    %48 = vector.shape_cast %47 : vector<128xf32> to vector<128x1xf32>
    %49 = vector.broadcast %48 : vector<128x1xf32> to vector<128x128xf32>
    %50 = arith.subf %46, %49 : vector<128x128xf32>
    %51 = math.exp %50 : vector<128x128xf32>
    %cst_35 = arith.constant dense<0.000000e+00> : vector<128xf32>
    %52 = vector.multi_reduction <add>, %51, %cst_35 [1] : vector<128x128xf32> to vector<128xf32>
    %53 = vector.shape_cast %52 : vector<128xf32> to vector<128x1xf32>
    %54 = tpu.reciprocal %53 {approx = true} : vector<128x1xf32> -> vector<128x1xf32>
    %55 = vector.broadcast %54 : vector<128x1xf32> to vector<128x128xf32>
    %56 = arith.mulf %51, %55 : vector<128x128xf32>
    %c0_36 = arith.constant 0 : index
    %c0_37 = arith.constant 0 : index
    %57 = vector.load %arg18[%c0_36, %c0_37] : memref<128x128xf32, #tpu.memory_space<vmem>>, vector<128x128xf32>
    tpu.vector_store %arg18[%c0_36, %c0_37], %56 {strides = array<i32>} : memref<128x128xf32, #tpu.memory_space<vmem>>, vector<128x128xf32>,
    %c0_38 = arith.constant 0 : index
    %c0_39 = arith.constant 0 : index
    %58 = vector.load %arg12[%c0_38, %c0_39] : memref<128x128xbf16, #tpu.memory_space<vmem>>, vector<128x128xbf16>
    %cst_40 = arith.constant dense<0.000000e+00> : vector<128x128xf32>
    %59 = tpu.matmul %19, %58, %cst_40 {dimension_numbers = #tpu.dot_dimension_numbers<[1], [0], [0], [1], [0, 0, 1, 1], [], []>} : vector<128x128xbf16>, vector<128x128xbf16>, vector<128x128xf32> -> vector<128x128xf32>
    %c0_41 = arith.constant 0 : index
    %c0_42 = arith.constant 0 : index
    %60 = vector.load %arg13[%c0_41, %c0_42] : memref<1x128xf32, #tpu.memory_space<vmem>>, vector<1x128xf32>
    %61 = vector.broadcast %60 : vector<1x128xf32> to vector<128x128xf32>
    %62 = arith.addf %59, %61 : vector<128x128xf32>
    %cst_43 = arith.constant 0.000000e+00 : f32
    %63 = vector.broadcast %cst_43 : f32 to vector<128x128xf32>
    %64 = arith.maximumf %62, %63 : vector<128x128xf32>
    %65 = arith.truncf %64 : vector<128x128xf32> to vector<128x128xbf16>
    %c0_44 = arith.constant 0 : index
    %c0_45 = arith.constant 0 : index
    %66 = vector.load %arg14[%c0_44, %c0_45] : memref<128x128xbf16, #tpu.memory_space<vmem>>, vector<128x128xbf16>
    %cst_46 = arith.constant dense<0.000000e+00> : vector<128x128xf32>
    %67 = tpu.matmul %65, %66, %cst_46 {dimension_numbers = #tpu.dot_dimension_numbers<[1], [0], [0], [1], [0, 0, 1, 1], [], []>} : vector<128x128xbf16>, vector<128x128xbf16>, vector<128x128xf32> -> vector<128x128xf32>
    %c0_47 = arith.constant 0 : index
    %c0_48 = arith.constant 0 : index
    %68 = vector.load %arg15[%c0_47, %c0_48] : memref<1x128xf32, #tpu.memory_space<vmem>>, vector<1x128xf32>
    %69 = vector.broadcast %68 : vector<1x128xf32> to vector<128x128xf32>
    %70 = arith.addf %67, %69 : vector<128x128xf32>
    %cst_49 = arith.constant 0.000000e+00 : f32
    %71 = vector.broadcast %cst_49 : f32 to vector<128x128xf32>
    %72 = arith.maximumf %70, %71 : vector<128x128xf32>
    %73 = arith.truncf %72 : vector<128x128xf32> to vector<128x128xbf16>
    %c0_50 = arith.constant 0 : index
    %c0_51 = arith.constant 0 : index
    %74 = vector.load %arg16[%c0_50, %c0_51] : memref<128x128xbf16, #tpu.memory_space<vmem>>, vector<128x128xbf16>
    %cst_52 = arith.constant dense<0.000000e+00> : vector<128x128xf32>
    %75 = tpu.matmul %73, %74, %cst_52 {dimension_numbers = #tpu.dot_dimension_numbers<[1], [0], [0], [1], [0, 0, 1, 1], [], []>} : vector<128x128xbf16>, vector<128x128xbf16>, vector<128x128xf32> -> vector<128x128xf32>
    %c0_53 = arith.constant 0 : index
    %c0_54 = arith.constant 0 : index
    %76 = vector.load %arg17[%c0_53, %c0_54] : memref<1x128xf32, #tpu.memory_space<vmem>>, vector<1x128xf32>
    %77 = vector.broadcast %76 : vector<1x128xf32> to vector<128x128xf32>
    %78 = arith.addf %75, %77 : vector<128x128xf32>
    %c0_55 = arith.constant 0 : index
    %c0_56 = arith.constant 0 : index
    %79 = vector.load %arg19[%c0_55, %c0_56] : memref<128x128xf32, #tpu.memory_space<vmem>>, vector<128x128xf32>
    tpu.vector_store %arg19[%c0_55, %c0_56], %78 {strides = array<i32>} : memref<128x128xf32, #tpu.memory_space<vmem>>, vector<128x128xf32>,
    return
  }
}

</mosaic_0001>

<bundles_post_ra>
// kernel: tpu_custom_call.1
= control target key start
LH: loop header
LB: loop body
LE: loop exit
PB: predicated region body
PF: predicated region fallthrough
CT: control target
= control target key end

     0   :  { %s3879_s0 = inlined_call_operand.hbm [shape: bf16[128,128], index: 0, kind: input, shape index: {}]   ;;  %s3880_s1 = inlined_call_operand.hbm [shape: bf16[128,128], index: 1, kind: input, shape index: {}]   ;;  %s3881_s2 = inlined_call_operand.hbm [shape: bf16[128,128], index: 2, kind: input, shape index: {}]   ;;  %s3882_s3 = inlined_call_operand.vmem [shape: f32[1,128], index: 3, kind: input, shape index: {}]   ;;  %s3883_s4 = inlined_call_operand.hbm [shape: bf16[128,128], index: 4, kind: input, shape index: {}]   ;;  %s3884_s5 = inlined_call_operand.vmem [shape: f32[1,128], index: 5, kind: input, shape index: {}]   ;;  %s3885_s6 = inlined_call_operand.hbm [shape: bf16[128,128], index: 6, kind: input, shape index: {}]   ;;  %s3886_s7 = inlined_call_operand.vmem [shape: f32[1,128], index: 7, kind: input, shape index: {}]   ;;  %s3887_s8 = inlined_call_operand.hbm [shape: bf16[128,128], index: 8, kind: input, shape index: {}]   ;;  %s3888_s9 = inlined_call_operand.vmem [shape: f32[1,128], index: 9, kind: input, shape index: {}]   ;;  %s3889_s10 = inlined_call_operand.hbm [shape: bf16[128,128], index: 10, kind: input, shape index: {}]   ;;  %s3890_s11 = inlined_call_operand.vmem [shape: f32[1,128], index: 11, kind: input, shape index: {}]   ;;  %s3891_s12 = inlined_call_operand.hbm [shape: bf16[128,128], index: 12, kind: input, shape index: {}]   ;;  %s3892_s13 = inlined_call_operand.vmem [shape: f32[1,128], index: 13, kind: input, shape index: {}]   ;;  %s3893_s14 = inlined_call_operand.hbm [shape: bf16[128,128], index: 14, kind: input, shape index: {}]   ;;  %s3894_s15 = inlined_call_operand.vmem [shape: f32[1,128], index: 15, kind: input, shape index: {}]   ;;  %s3895_s16 = inlined_call_operand.hbm [shape: bf16[128,128], index: 16, kind: input, shape index: {}]   ;;  %s3896_s17 = inlined_call_operand.vmem [shape: f32[1,128], index: 17, kind: input, shape index: {}]   ;;  %s3897_s18 = inlined_call_operand.hbm [shape: f32[128,128], index: 18, kind: output, shape index: {0}]   ;;  %s3898_s19 = inlined_call_operand.hbm [shape: f32[128,128], index: 19, kind: output, shape index: {1}]   ;;  %s3899_s20 = inlined_call_operand.hbm [shape: f32[128,128], index: 20, kind: output, shape index: {2}]  }
   0x1   :  { %3900 = sst [smem:[#allocation31_spill]] %s3879_s0 }
   0x2   :  { %3901 = sst [smem:[#allocation32_spill]] %s3880_s1 }
   0x3   :  { %3902 = sst [smem:[#allocation33_spill]] %s3881_s2 }
   0x4   :  { %3903 = sst [smem:[#allocation34_spill]] %s3882_s3 }
   0x5   :  { %3904 = sst [smem:[#allocation35_spill]] %s3883_s4 }
   0x6   :  { %26 = vsyncpa [#allocation3], 0 }
   0x7   :  { %27 = vsyncpa [#allocation6], 0 }
   0x8   :  { %28 = vsyncpa [#allocation9], 0 }
   0x9   :  { %29 = vsyncpa [#allocation12], 0 }
   0xa   :  { %30 = vsyncpa [#allocation15], 0 }
   0xb   :  { %31 = vsyncpa [#allocation18], 0 }
   0xc   :  { %32 = vsyncpa [#allocation4], 0 }
   0xd   :  { %33 = vsyncpa [#allocation21], 0  ;;  %s3360_s1 = smov [#allocation5]   ;;  %s3361_s23 = smov [#allocation8]  }
   0xe   :  { %s51_s22 = sshll.u32 %s3360_s1, 4  ;;  %s77_s24 = sshll.u32 %s3361_s23, 4  ;;  %s52_s22 = int_to_ptr.vmem [resolvable:$true] %s51_s22  ;;  %s78_s24 = int_to_ptr.vmem [resolvable:$true] %s77_s24 }
   0xf   :  { %s3092_s2 = scalar_lea.vmem %s52_s22, 1024  ;;  %p3097_p1 = scmp.lt.s32.totalorder %s52_s22, %s52_s22 }
  0x10   :  { %p3093_p0 = scmp.ne.s32.totalorder %s52_s22, %s3092_s2  ;;  %p3098_p2 = scmp.lt.s32.totalorder %s3092_s2, %s3092_s2 }
  0x12   :  { %p3099_p3 = por %p3098_p2, %p3097_p1 }
  0x14   :  { %p3100_p4 = pnand %p3099_p3, %p3093_p0 }
  0x16   :  { %3103 = shalt.err (!%p3100_p4)
}
  0x17   :  { %s3362_s25 = smov 64   ;;  %s3363_s3 = smov 4  }
  0x18   :  { %s3905_s28 = sld [smem:[#allocation32_spill]]  ;;  %s3112_s4 = scalar_lea.vmem %s78_s24, 1024 }
  0x19   :  { %p3113_p5 = scmp.ne.s32.totalorder %s78_s24, %s3112_s4  ;;  %p3117_p6 = scmp.lt.s32.totalorder %s78_s24, %s78_s24 }
  0x1a   :  { %p3118_p7 = scmp.lt.s32.totalorder %s3112_s4, %s3112_s4 }
  0x1c   :  { %p3119_p8 = por %p3118_p7, %p3117_p6 }
  0x1e   :  { %57 = dma.hbm_to_vmem [thread:$0]  %s3905_s28, 1024, %s52_s22, [#allocation6], %s3362_s25, %s3362_s25, %s3363_s3  }
  0x1f   :  { %p3120_p9 = pnand %p3119_p8, %p3113_p5 }
  0x21   :  { %3123 = shalt.err (!%p3120_p9)
}
  0x22   :  { %s3906_s0 = sld [smem:[#allocation35_spill]]  ;;  %s3364_s21 = smov [#allocation11]  }
  0x23   :  { %s105_s1 = sshll.u32 %s3364_s21, 4  ;;  %s3365_s23 = smov [#allocation14]   ;;  %s106_s1 = int_to_ptr.vmem [resolvable:$true] %s105_s1 }
  0x24   :  { %s133_s2 = sshll.u32 %s3365_s23, 4  ;;  %s3132_s22 = scalar_lea.vmem %s106_s1, 1024  ;;  %s134_s2 = int_to_ptr.vmem [resolvable:$true] %s133_s2 }
  0x25   :  { %p3133_p10 = scmp.ne.s32.totalorder %s106_s1, %s3132_s22  ;;  %p3137_p11 = scmp.lt.s32.totalorder %s106_s1, %s106_s1 }
  0x26   :  { %p3138_p12 = scmp.lt.s32.totalorder %s3132_s22, %s3132_s22 }
  0x28   :  { %83 = dma.hbm_to_vmem [thread:$0]  %s3906_s0, 1024, %s78_s24, [#allocation9], %s3362_s25, %s3362_s25, %s3363_s3  }
  0x29   :  { %p3139_p13 = por %p3138_p12, %p3137_p11 }
  0x2b   :  { %p3140_p0 = pnand %p3139_p13, %p3133_p10 }
  0x2d   :  { %3143 = shalt.err (!%p3140_p0)
}
  0x2e   :  { %111 = dma.hbm_to_vmem [thread:$0]  %s3887_s8, 1024, %s106_s1, [#allocation12], %s3362_s25, %s3362_s25, %s3363_s3  }
  0x2f   :  { %s3152_s24 = scalar_lea.vmem %s134_s2, 1024  ;;  %p3157_p2 = scmp.lt.s32.totalorder %s134_s2, %s134_s2 }
  0x30   :  { %p3153_p1 = scmp.ne.s32.totalorder %s134_s2, %s3152_s24  ;;  %p3158_p3 = scmp.lt.s32.totalorder %s3152_s24, %s3152_s24 }
  0x32   :  { %p3159_p4 = por %p3158_p3, %p3157_p2 }
  0x34   :  { %p3160_p5 = pnand %p3159_p4, %p3153_p1 }
  0x36   :  { %3163 = shalt.err (!%p3160_p5)
}
  0x37   :  { %139 = dma.hbm_to_vmem [thread:$0]  %s3891_s12, 1024, %s134_s2, [#allocation15], %s3362_s25, %s3362_s25, %s3363_s3  }
  0x38   :  { %s3366_s29 = smov [#allocation2]   ;;  %s3367_s0 = smov [#allocation7]  }
  0x39   :  { %s39_s30 = sshll.u32 %s3366_s29, 4  ;;  %s63_s21 = sshll.u32 %s3367_s0, 4  ;;  %s40_s30 = int_to_ptr.vmem [resolvable:$true] %s39_s30  ;;  %s64_s21 = int_to_ptr.vmem [resolvable:$true] %s63_s21 }
  0x3a   :  { %s3172_s8 = scalar_lea.vmem %s40_s30, 1024  ;;  %p3177_p7 = scmp.lt.s32.totalorder %s40_s30, %s40_s30 }
  0x3b   :  { %p3173_p6 = scmp.ne.s32.totalorder %s40_s30, %s3172_s8  ;;  %p3178_p8 = scmp.lt.s32.totalorder %s3172_s8, %s3172_s8 }
  0x3d   :  { %p3179_p9 = por %p3178_p8, %p3177_p7 }
  0x3f   :  { %p3180_p10 = pnand %p3179_p9, %p3173_p6 }
  0x41   :  { %3183 = shalt.err (!%p3180_p10)
}
  0x42   :  { %s3907_s22 = sld [smem:[#allocation31_spill]]  ;;  %s3192_s12 = scalar_lea.vmem %s64_s21, 1024 }
  0x43   :  { %p3193_p11 = scmp.ne.s32.totalorder %s64_s21, %s3192_s12  ;;  %p3197_p12 = scmp.lt.s32.totalorder %s64_s21, %s64_s21 }
  0x44   :  { %p3198_p13 = scmp.lt.s32.totalorder %s3192_s12, %s3192_s12 }
  0x46   :  { %p3199_p0 = por %p3198_p13, %p3197_p12 }
  0x48   :  { %45 = dma.hbm_to_vmem [thread:$0]  %s3907_s22, 1024, %s40_s30, [#allocation3], %s3362_s25, %s3362_s25, %s3363_s3  }
  0x49   :  { %p3200_p1 = pnand %p3199_p0, %p3193_p11 }
  0x4b   :  { %3203 = shalt.err (!%p3200_p1)
}
  0x4c   :  { %s3908_s27 = sld [smem:[#allocation33_spill]]  ;;  %s3368_s24 = smov [#allocation10]  }
  0x4d   :  { %s91_s28 = sshll.u32 %s3368_s24, 4  ;;  %s3369_s4 = smov [#allocation13]   ;;  %s92_s28 = int_to_ptr.vmem [resolvable:$true] %s91_s28 }
  0x4e   :  { %s119_s29 = sshll.u32 %s3369_s4, 4  ;;  %s3212_s30 = scalar_lea.vmem %s92_s28, 1024  ;;  %s120_s29 = int_to_ptr.vmem [resolvable:$true] %s119_s29 }
  0x4f   :  { %p3213_p2 = scmp.ne.s32.totalorder %s92_s28, %s3212_s30  ;;  %p3217_p3 = scmp.lt.s32.totalorder %s92_s28, %s92_s28 }
  0x50   :  { %p3218_p4 = scmp.lt.s32.totalorder %s3212_s30, %s3212_s30 }
  0x52   :  { %69 = dma.hbm_to_vmem [thread:$0]  %s3908_s27, 1024, %s64_s21, [#allocation6], %s3362_s25, %s3362_s25, %s3363_s3  }
  0x53   :  { %p3219_p5 = por %p3218_p4, %p3217_p3 }
  0x55   :  { %p3220_p6 = pnand %p3219_p5, %p3213_p2 }
  0x57   :  { %3223 = shalt.err (!%p3220_p6)
}
  0x58   :  { %97 = dma.hbm_to_vmem [thread:$0]  %s3885_s6, 1024, %s92_s28, [#allocation9], %s3362_s25, %s3362_s25, %s3363_s3  }
  0x59   :  { %s3232_s21 = scalar_lea.vmem %s120_s29, 1024  ;;  %p3237_p8 = scmp.lt.s32.totalorder %s120_s29, %s120_s29 }
  0x5a   :  { %p3233_p7 = scmp.ne.s32.totalorder %s120_s29, %s3232_s21  ;;  %p3238_p9 = scmp.lt.s32.totalorder %s3232_s21, %s3232_s21 }
  0x5c   :  { %p3239_p10 = por %p3238_p9, %p3237_p8 }
  0x5e   :  { %p3240_p11 = pnand %p3239_p10, %p3233_p7 }
  0x60   :  { %3243 = shalt.err (!%p3240_p11)
}
  0x61   :  { %125 = dma.hbm_to_vmem [thread:$0]  %s3889_s10, 1024, %s120_s29, [#allocation12], %s3362_s25, %s3362_s25, %s3363_s3  }
  0x62   :  { %s3370_s22 = smov [#allocation16]   ;;  %s3371_s2 = smov [#allocation17]  }
  0x63   :  { %s147_s12 = sshll.u32 %s3370_s22, 4  ;;  %s161_s26 = sshll.u32 %s3371_s2, 4  ;;  %s148_s12 = int_to_ptr.vmem [resolvable:$true] %s147_s12  ;;  %s162_s26 = int_to_ptr.vmem [resolvable:$true] %s161_s26 }
  0x64   :  { %s3252_s6 = scalar_lea.vmem %s148_s12, 1024  ;;  %p3257_p13 = scmp.lt.s32.totalorder %s148_s12, %s148_s12 }
  0x65   :  { %p3253_p12 = scmp.ne.s32.totalorder %s148_s12, %s3252_s6  ;;  %p3258_p0 = scmp.lt.s32.totalorder %s3252_s6, %s3252_s6 }
  0x67   :  { %p3259_p1 = por %p3258_p0, %p3257_p13 }
  0x69   :  { %p3260_p2 = pnand %p3259_p1, %p3253_p12 }
  0x6b   :  { %3263 = shalt.err (!%p3260_p2)
}
  0x6c   :  { %153 = dma.hbm_to_vmem [thread:$0]  %s3893_s14, 1024, %s148_s12, [#allocation15], %s3362_s25, %s3362_s25, %s3363_s3  }
  0x6d   :  { %s3272_s10 = scalar_lea.vmem %s162_s26, 1024  ;;  %p3277_p4 = scmp.lt.s32.totalorder %s162_s26, %s162_s26 }
  0x6e   :  { %p3273_p3 = scmp.ne.s32.totalorder %s162_s26, %s3272_s10  ;;  %p3278_p5 = scmp.lt.s32.totalorder %s3272_s10, %s3272_s10 }
  0x70   :  { %p3279_p6 = por %p3278_p5, %p3277_p4 }
  0x72   :  { %p3280_p7 = pnand %p3279_p6, %p3273_p3 }
  0x74   :  { %3283 = shalt.err (!%p3280_p7)
}
  0x75   :  { %167 = dma.hbm_to_vmem [thread:$0]  %s3895_s16, 1024, %s162_s26, [#allocation18], %s3362_s25, %s3362_s25, %s3363_s3  }
  0x76   :  { %3344 = dma.done.wait [#allocation3], 1024  }
  0x77   :  { %3345 = vsyncadd [#allocation3], 4294966272 }
  0x78   :  { %3346 = dma.done.wait [#allocation6], 2048  }
  0x79   :  { %3347 = vsyncadd [#allocation6], 4294965248 }
  0x7a   :  { %3348 = dma.done.wait [#allocation9], 2048  }
  0x7b   :  { %3349 = vsyncadd [#allocation9], 4294965248 }
  0x7c   :  { %3350 = dma.done.wait [#allocation12], 2048  }
  0x7d   :  { %3351 = vsyncadd [#allocation12], 4294965248 }
  0x7e   :  { %3352 = dma.done.wait [#allocation15], 2048  }
  0x7f   :  { %3353 = vsyncadd [#allocation15], 4294965248 }
  0x80   :  { %3354 = dma.done.wait [#allocation18], 1024  }
  0x81   :  { %3355 = vsyncadd [#allocation18], 4294966272  ;;  %v2876_v0 = vld [vmem:[#allocation7 + $0x38] sm:$0xff]   ;;  %v2877_v1 = vld [vmem:[#allocation7 + $0x30] sm:$0xff]   ;;  %s3909_s25 = sld [smem:[#allocation34_spill]]  ;;  %s3373_s12 = smov [#allocation22]  }
  0x82   :  { %2539 = vmatprep.subr.bf16.mxu0 %v2876_v0  ;;  %v2878_v2 = vld [vmem:[#allocation7 + $0x28] sm:$0xff]   ;;  %v2879_v3 = vld [vmem:[#allocation7 + $0x20] sm:$0xff]   ;;  %v2880_v5 = vld [vmem:[#allocation7 + $0x18] sm:$0xff]   ;;  %s2267_s2 = sshll.u32 %s3373_s12, 4  ;;  %s2268_s2 = int_to_ptr.vmem [resolvable:$true] %s2267_s2 }
  0x83   :  { %2540 = vmatpush3.bf16.msra.mxu0 %v2876_v0  ;;  %v2884_v4 = vld [vmem:[#allocation5] sm:$0xff]   ;;  %v2881_v6 = vld [vmem:[#allocation7 + $0x10] sm:$0xff]   ;;  %v2882_v7 = vld [vmem:[#allocation7 + $0x8] sm:$0xff]  }
  0x84   :  { %2541 = vmatprep.subr.bf16.mxu0 %v2877_v1  ;;  %2555 = vmatprep.mubr.bf16.mxu0 %v2884_v4  ;;  %v2883_v8 = vld [vmem:[#allocation7] sm:$0xff]   ;;  %v2885_v9 = vld [vmem:[#allocation5 + $0x8] sm:$0xff]   ;;  %v2886_v10 = vld [vmem:[#allocation5 + $0x10] sm:$0xff]  }
  0x85   :  { %v2887_v11 = vld [vmem:[#allocation5 + $0x18] sm:$0xff]   ;;  %v2888_v12 = vld [vmem:[#allocation5 + $0x20] sm:$0xff]   ;;  %v2889_v13 = vld [vmem:[#allocation5 + $0x28] sm:$0xff]  }
  0x86   :  { %v2890_v14 = vld [vmem:[#allocation5 + $0x30] sm:$0xff]   ;;  %v2891_v15 = vld [vmem:[#allocation5 + $0x38] sm:$0xff]   ;;  %v2892_v16 = vld [vmem:[#allocation2] sm:$0xff]  }
  0x87   :  { %2542 = vmatpush3.bf16.msra.mxu0 %v2877_v1  ;;  %2587 = vmatprep.mubr.bf16.mxu1 %v2892_v16  ;;  %v2900_v17 = vld [vmem:[#allocation8 + $0x38] sm:$0xff]   ;;  %v2901_v18 = vld [vmem:[#allocation8 + $0x30] sm:$0xff]   ;;  %v3542_v43 = vld [vmem:[#allocation2 + $0x8] sm:$0xff]  }
  0x88   :  { %2543 = vmatprep.subr.bf16.mxu0 %v2878_v2  ;;  %v3544_v44 = vld [vmem:[#allocation2 + $0x10] sm:$0xff]   ;;  %v3548_v45 = vld [vmem:[#allocation2 + $0x18] sm:$0xff]   ;;  %v3550_v46 = vld [vmem:[#allocation2 + $0x20] sm:$0xff]  }
  0x89   :  { %v3554_v47 = vld [vmem:[#allocation2 + $0x28] sm:$0xff]   ;;  %v3556_v48 = vld [vmem:[#allocation2 + $0x30] sm:$0xff]   ;;  %v3560_v49 = vld [vmem:[#allocation2 + $0x38] sm:$0xff]  }
  0x8a   :  { %v2902_v50 = vld [vmem:[#allocation8 + $0x28] sm:$0xff]   ;;  %v2903_v51 = vld [vmem:[#allocation8 + $0x20] sm:$0xff]   ;;  %v2904_v52 = vld [vmem:[#allocation8 + $0x18] sm:$0xff]  }
  0x8b   :  { %2544 = vmatpush3.bf16.msra.mxu0 %v2878_v2  ;;  %v2905_v53 = vld [vmem:[#allocation8 + $0x10] sm:$0xff]   ;;  %v2906_v54 = vld [vmem:[#allocation8 + $0x8] sm:$0xff]   ;;  %v2907_v55 = vld [vmem:[#allocation8] sm:$0xff]  }
  0x8c   :  { %2545 = vmatprep.subr.bf16.mxu0 %v2879_v3  ;;  %v2307_v57 = vld [vmem:[%s3909_s25] ss:$0 sm:$0xff] }
  0x8f   :  { %2546 = vmatpush3.bf16.msra.mxu0 %v2879_v3 }
  0x90   :  { %2547 = vmatprep.subr.bf16.mxu0 %v2880_v5 }
  0x93   :  { %2548 = vmatpush3.bf16.msra.mxu0 %v2880_v5 }
  0x94   :  { %2549 = vmatprep.subr.bf16.mxu0 %v2881_v6 }
  0x97   :  { %2550 = vmatpush3.bf16.msra.mxu0 %v2881_v6 }
  0x98   :  { %2551 = vmatprep.subr.bf16.mxu0 %v2882_v7 }
  0x9b   :  { %2552 = vmatpush3.bf16.msra.mxu0 %v2882_v7 }
  0x9c   :  { %2553 = vmatprep.subr.bf16.mxu0 %v2883_v8 }
  0x9f   :  { %2554 = vmatpush3.bf16.msra.mxu0 %v2883_v8 }
  0xa0   :  { %2603 = vmatprep.subr.bf16.mxu0 %v2900_v17 }
  0xa2   :  { %2556 = vmatmul.mubr.bf16.vlgmr.msra.gmra.mxu0 %v2885_v9 }
  0xa3   :  { %2559 = vmatprep.mubr.bf16.mxu0 %v2886_v10  ;;  %2604 = vmatpush3.bf16.msra.mxu0 %v2900_v17 }
  0xa4   :  { %2605 = vmatprep.subr.bf16.mxu0 %v2901_v18 }
  0xa7   :  { %2606 = vmatpush3.bf16.msra.mxu0 %v2901_v18 }
  0xa8   :  { %2607 = vmatprep.subr.bf16.mxu0 %v2902_v50 }
  0xaa   :  { %2560 = vmatmul.mubr.bf16.gmra.mxu0 %v2887_v11 }
  0xab   :  { %2563 = vmatprep.mubr.bf16.mxu0 %v2888_v12  ;;  %2608 = vmatpush3.bf16.msra.mxu0 %v2902_v50 }
  0xac   :  { %2609 = vmatprep.subr.bf16.mxu0 %v2903_v51 }
  0xaf   :  { %2610 = vmatpush3.bf16.msra.mxu0 %v2903_v51 }
  0xb0   :  { %2611 = vmatprep.subr.bf16.mxu0 %v2904_v52 }
  0xb2   :  { %2564 = vmatmul.mubr.bf16.gmra.mxu0 %v2889_v13 }
  0xb3   :  { %2567 = vmatprep.mubr.bf16.mxu0 %v2890_v14  ;;  %2612 = vmatpush3.bf16.msra.mxu0 %v2904_v52 }
  0xb4   :  { %2613 = vmatprep.subr.bf16.mxu0 %v2905_v53 }
  0xb7   :  { %2614 = vmatpush3.bf16.msra.mxu0 %v2905_v53 }
  0xb8   :  { %2615 = vmatprep.subr.bf16.mxu0 %v2906_v54 }
  0xba   :  { %2568 = vmatmul.mubr.bf16.gmra.mxu0 %v2891_v15 }
  0xbb   :  { %2616 = vmatpush3.bf16.msra.mxu0 %v2906_v54 }
  0xbc   :  { %2617 = vmatprep.subr.bf16.mxu0 %v2907_v55 }
  0xbf   :  { %2618 = vmatpush3.bf16.msra.mxu0 %v2907_v55 }
 0x162   :  { %v2557_v19 = vpop.f32.mrf.mxu0 }
 0x164   :  { %v379_v20 = vpop.f32.mrf.mxu0 }
 0x166   :  { %v2558_v21 = vpop.f32.mrf.mxu0 }
 0x167   :  { %v443_v41 = vpack.c.bf16 %v2558_v21, %v2557_v19 }
 0x168   :  { %v382_v22 = vpop.f32.mrf.mxu0 }
 0x169   :  { %v442_v42 = vpack.c.bf16 %v382_v22, %v379_v20 }
 0x16a   :  { %v2561_v23 = vpop.f32.mrf.mxu0 }
 0x16c   :  { %v395_v24 = vpop.f32.mrf.mxu0 }
 0x16e   :  { %v2562_v25 = vpop.f32.mrf.mxu0 }
 0x16f   :  { %v445_v39 = vpack.c.bf16 %v2562_v25, %v2561_v23 }
 0x170   :  { %v398_v26 = vpop.f32.mrf.mxu0 }
 0x171   :  { %v444_v40 = vpack.c.bf16 %v398_v26, %v395_v24 }
 0x172   :  { %v2565_v27 = vpop.f32.mrf.mxu0 }
 0x174   :  { %v411_v28 = vpop.f32.mrf.mxu0 }
 0x176   :  { %v2566_v29 = vpop.f32.mrf.mxu0 }
 0x177   :  { %v447_v37 = vpack.c.bf16 %v2566_v29, %v2565_v27 }
 0x178   :  { %v414_v30 = vpop.f32.mrf.mxu0 }
 0x179   :  { %v446_v38 = vpack.c.bf16 %v414_v30, %v411_v28 }
 0x17a   :  { %v2569_v31 = vpop.f32.mrf.mxu0 }
 0x17c   :  { %v427_v32 = vpop.f32.mrf.mxu0 }
 0x17e   :  { %v2570_v33 = vpop.f32.mrf.mxu0 }
 0x17f   :  { %v449_v34 = vpack.c.bf16 %v2570_v33, %v2569_v31 }
 0x180   :  { %v430_v35 = vpop.f32.mrf.mxu0 }
 0x181   :  { %v448_v36 = vpack.c.bf16 %v430_v35, %v427_v32  ;;  %2571 = vmatprep.subr.bf16.mxu1 %v449_v34 }
 0x182   :  { %2572 = vmatpush3.bf16.msra.mxu1 %v449_v34 }
 0x183   :  { %2573 = vmatprep.subr.bf16.mxu1 %v448_v36 }
 0x186   :  { %2574 = vmatpush3.bf16.msra.mxu1 %v448_v36 }
 0x187   :  { %2575 = vmatprep.subr.bf16.mxu1 %v447_v37 }
 0x18a   :  { %2576 = vmatpush3.bf16.msra.mxu1 %v447_v37 }
 0x18b   :  { %2577 = vmatprep.subr.bf16.mxu1 %v446_v38 }
 0x18e   :  { %2578 = vmatpush3.bf16.msra.mxu1 %v446_v38 }
 0x18f   :  { %2579 = vmatprep.subr.bf16.mxu1 %v445_v39 }
 0x192   :  { %2580 = vmatpush3.bf16.msra.mxu1 %v445_v39 }
 0x193   :  { %2581 = vmatprep.subr.bf16.mxu1 %v444_v40 }
 0x196   :  { %2582 = vmatpush3.bf16.msra.mxu1 %v444_v40 }
 0x197   :  { %2583 = vmatprep.subr.bf16.mxu1 %v443_v41 }
 0x19a   :  { %2584 = vmatpush3.bf16.msra.mxu1 %v443_v41 }
 0x19b   :  { %2585 = vmatprep.subr.bf16.mxu1 %v442_v42 }
 0x19e   :  { %2586 = vmatpush3.bf16.msra.mxu1 %v442_v42 }
 0x1a1   :  { %2588 = vmatmul.mubr.bf16.vlgmr.msra.gmra.mxu1 %v3542_v43 }
 0x1a2   :  { %2591 = vmatprep.mubr.bf16.mxu1 %v3544_v44 }
 0x1a9   :  { %2592 = vmatmul.mubr.bf16.gmra.mxu1 %v3548_v45 }
 0x1aa   :  { %2595 = vmatprep.mubr.bf16.mxu1 %v3550_v46 }
 0x1b1   :  { %2596 = vmatmul.mubr.bf16.gmra.mxu1 %v3554_v47 }
 0x1b2   :  { %2599 = vmatprep.mubr.bf16.mxu1 %v3556_v48 }
 0x1b9   :  { %2600 = vmatmul.mubr.bf16.gmra.mxu1 %v3560_v49 }
 0x1ba   :  { %2651 = vmatprep.mubr.bf16.mxu1 %v2892_v16 }
 0x261   :  { %v2589_v56 = vpop.f32.mrf.mxu1 }
 0x262   :  { %v548_v62 = vadd.f32 %v2589_v56, %v2307_v57  ;;  %v2908_v56 = vld [vmem:[#allocation10 + $0x38] sm:$0xff]  }
 0x263   :  { %v539_v58 = vpop.f32.mrf.mxu1  ;;  %2667 = vmatprep.subr.bf16.mxu0 %v2908_v56 }
 0x264   :  { %v540_v59 = vadd.f32 %v2307_v57, %v539_v58 }
 0x265   :  { %v2590_v60 = vpop.f32.mrf.mxu1 }
 0x266   :  { %v551_v61 = vadd.f32 %v2590_v60, %v2307_v57  ;;  %2956 = vtanh.f32 %v540_v59 }
 0x267   :  { %v542_v63 = vpop.f32.mrf.mxu1 }
 0x268   :  { %v543_v0 = vadd.f32 %v2307_v57, %v542_v63  ;;  %2958 = vtanh.f32 %v551_v61 }
 0x269   :  { %v2593_v1 = vpop.f32.mrf.mxu1 }
 0x26a   :  { %2960 = vtanh.f32 %v543_v0  ;;  %v564_v6 = vadd.f32 %v2593_v1, %v2307_v57 }
 0x26b   :  { %2962 = vtanh.f32 %v548_v62  ;;  %v555_v2 = vpop.f32.mrf.mxu1 }
 0x26c   :  { %v556_v3 = vadd.f32 %v2307_v57, %v555_v2 }
 0x26d   :  { %v2594_v4 = vpop.f32.mrf.mxu1 }
 0x26e   :  { %v567_v5 = vadd.f32 %v2594_v4, %v2307_v57  ;;  %2964 = vtanh.f32 %v556_v3 }
 0x26f   :  { %v558_v7 = vpop.f32.mrf.mxu1 }
 0x270   :  { %v559_v8 = vadd.f32 %v2307_v57, %v558_v7  ;;  %2966 = vtanh.f32 %v567_v5 }
 0x271   :  { %v2597_v9 = vpop.f32.mrf.mxu1 }
 0x272   :  { %2968 = vtanh.f32 %v559_v8  ;;  %v580_v17 = vadd.f32 %v2597_v9, %v2307_v57 }
 0x273   :  { %2970 = vtanh.f32 %v564_v6  ;;  %v571_v10 = vpop.f32.mrf.mxu1  ;;  %v2957_v12 = vpop.eup %2956 }
 0x274   :  { %v572_v11 = vadd.f32 %v2307_v57, %v571_v10 }
 0x275   :  { %v2598_v13 = vpop.f32.mrf.mxu1  ;;  %v2959_v14 = vpop.eup %2958 }
 0x276   :  { %v583_v15 = vadd.f32 %v2598_v13, %v2307_v57  ;;  %2972 = vtanh.f32 %v572_v11 }
 0x277   :  { %v2961_v16 = vpop.eup %2960  ;;  %v574_v18 = vpop.f32.mrf.mxu1 }
 0x278   :  { %v2963_v19 = vpop.eup %2962  ;;  %v575_v20 = vadd.f32 %v2307_v57, %v574_v18  ;;  %v618_v21 = vpack.c.bf16 %v2961_v16, %v2957_v12  ;;  %2974 = vtanh.f32 %v583_v15  ;;  %v2910_v18 = vld [vmem:[#allocation10 + $0x28] sm:$0xff]  }
 0x279   :  { %v2601_v22 = vpop.f32.mrf.mxu1  ;;  %v619_v23 = vpack.c.bf16 %v2959_v14, %v2963_v19  ;;  %v2911_v19 = vld [vmem:[#allocation10 + $0x20] sm:$0xff]  }
 0x27a   :  { %2976 = vtanh.f32 %v575_v20  ;;  %2619 = vmatprep.mubr.bf16.mxu0 %v618_v21  ;;  %v596_v31 = vadd.f32 %v2601_v22, %v2307_v57  ;;  %v2912_v20 = vld [vmem:[#allocation10 + $0x18] sm:$0xff]   ;;  %v3576_v22 = vld [vmem:[%s3884_s5] ss:$0 sm:$0xff] }
 0x27b   :  { %2978 = vtanh.f32 %v580_v17  ;;  %v587_v24 = vpop.f32.mrf.mxu1  ;;  %2620 = vmatmul.mubr.bf16.vlgmr.msra.gmra.mxu0 %v619_v23  ;;  %v2965_v26 = vpop.eup %2964  ;;  %v2920_v21 = vld [vmem:[#allocation11 + $0x18] sm:$0xff]  }
 0x27c   :  { %v588_v25 = vadd.f32 %v2307_v57, %v587_v24  ;;  %2668 = vmatpush3.bf16.msra.mxu0 %v2908_v56 }
 0x27d   :  { %v2602_v27 = vpop.f32.mrf.mxu1  ;;  %v2967_v28 = vpop.eup %2966 }
 0x27e   :  { %v599_v29 = vadd.f32 %v2602_v27, %v2307_v57  ;;  %2980 = vtanh.f32 %v588_v25 }
 0x27f   :  { %v2969_v30 = vpop.eup %2968  ;;  %v590_v32 = vpop.f32.mrf.mxu1 }
 0x280   :  { %v2971_v33 = vpop.eup %2970  ;;  %v591_v34 = vadd.f32 %v2307_v57, %v590_v32  ;;  %v620_v35 = vpack.c.bf16 %v2969_v30, %v2965_v26  ;;  %2982 = vtanh.f32 %v599_v29  ;;  %v2909_v57 = vld [vmem:[#allocation10 + $0x30] sm:$0xff]  }
 0x281   :  { %v621_v36 = vpack.c.bf16 %v2967_v28, %v2971_v33  ;;  %2669 = vmatprep.subr.bf16.mxu0 %v2909_v57 }
 0x282   :  { %2984 = vtanh.f32 %v591_v34  ;;  %2623 = vmatprep.mubr.bf16.mxu0 %v620_v35  ;;  %2670 = vmatpush3.bf16.msra.mxu0 %v2909_v57 }
 0x283   :  { %2986 = vtanh.f32 %v596_v31  ;;  %2624 = vmatmul.mubr.bf16.gmra.mxu0 %v621_v36  ;;  %v2973_v37 = vpop.eup %2972  ;;  %2671 = vmatprep.subr.bf16.mxu0 %v2910_v18 }
 0x285   :  { %v2975_v38 = vpop.eup %2974 }
 0x286   :  { %2672 = vmatpush3.bf16.msra.mxu0 %v2910_v18 }
 0x287   :  { %v2977_v39 = vpop.eup %2976  ;;  %2673 = vmatprep.subr.bf16.mxu0 %v2911_v19 }
 0x288   :  { %v2979_v40 = vpop.eup %2978  ;;  %v622_v41 = vpack.c.bf16 %v2977_v39, %v2973_v37 }
 0x289   :  { %v623_v42 = vpack.c.bf16 %v2975_v38, %v2979_v40 }
 0x28a   :  { %2627 = vmatprep.mubr.bf16.mxu0 %v622_v41  ;;  %2674 = vmatpush3.bf16.msra.mxu0 %v2911_v19 }
 0x28b   :  { %2628 = vmatmul.mubr.bf16.gmra.mxu0 %v623_v42  ;;  %v2981_v50 = vpop.eup %2980  ;;  %2675 = vmatprep.subr.bf16.mxu0 %v2912_v20 }
 0x28d   :  { %v2983_v51 = vpop.eup %2982 }
 0x28e   :  { %2676 = vmatpush3.bf16.msra.mxu0 %v2912_v20 }
 0x28f   :  { %v2985_v52 = vpop.eup %2984 }
 0x290   :  { %v2987_v53 = vpop.eup %2986  ;;  %v624_v54 = vpack.c.bf16 %v2985_v52, %v2981_v50 }
 0x291   :  { %v625_v55 = vpack.c.bf16 %v2983_v51, %v2987_v53 }
 0x292   :  { %2631 = vmatprep.mubr.bf16.mxu0 %v624_v54 }
 0x293   :  { %2632 = vmatmul.mubr.bf16.gmra.mxu0 %v625_v55 }
 0x33b   :  { %v2621_v58 = vpop.f32.mrf.mxu0 }
 0x33d   :  { %v724_v59 = vpop.f32.mrf.mxu0 }
 0x33f   :  { %v2622_v60 = vpop.f32.mrf.mxu0 }
 0x340   :  { %v788_v16 = vpack.c.bf16 %v2622_v60, %v2621_v58 }
 0x341   :  { %v727_v61 = vpop.f32.mrf.mxu0 }
 0x342   :  { %v787_v17 = vpack.c.bf16 %v727_v61, %v724_v59 }
 0x343   :  { %v2625_v62 = vpop.f32.mrf.mxu0 }
 0x345   :  { %v740_v63 = vpop.f32.mrf.mxu0 }
 0x347   :  { %v2626_v0 = vpop.f32.mrf.mxu0 }
 0x348   :  { %v790_v14 = vpack.c.bf16 %v2626_v0, %v2625_v62 }
 0x349   :  { %v743_v1 = vpop.f32.mrf.mxu0 }
 0x34a   :  { %v789_v15 = vpack.c.bf16 %v743_v1, %v740_v63 }
 0x34b   :  { %v2629_v2 = vpop.f32.mrf.mxu0 }
 0x34d   :  { %v756_v3 = vpop.f32.mrf.mxu0 }
 0x34f   :  { %v2630_v4 = vpop.f32.mrf.mxu0 }
 0x350   :  { %v792_v12 = vpack.c.bf16 %v2630_v4, %v2629_v2 }
 0x351   :  { %v759_v5 = vpop.f32.mrf.mxu0 }
 0x352   :  { %v791_v13 = vpack.c.bf16 %v759_v5, %v756_v3 }
 0x353   :  { %v2633_v6 = vpop.f32.mrf.mxu0 }
 0x355   :  { %v772_v7 = vpop.f32.mrf.mxu0 }
 0x357   :  { %v2634_v8 = vpop.f32.mrf.mxu0 }
 0x358   :  { %v794_v9 = vpack.c.bf16 %v2634_v8, %v2633_v6 }
 0x359   :  { %v775_v10 = vpop.f32.mrf.mxu0 }
 0x35a   :  { %v793_v11 = vpack.c.bf16 %v775_v10, %v772_v7  ;;  %2635 = vmatprep.subr.bf16.mxu1 %v794_v9 }
 0x35b   :  { %2636 = vmatpush3.bf16.msra.mxu1 %v794_v9 }
 0x35c   :  { %2637 = vmatprep.subr.bf16.mxu1 %v793_v11 }
 0x35f   :  { %2638 = vmatpush3.bf16.msra.mxu1 %v793_v11 }
 0x360   :  { %2639 = vmatprep.subr.bf16.mxu1 %v792_v12 }
 0x363   :  { %2640 = vmatpush3.bf16.msra.mxu1 %v792_v12 }
 0x364   :  { %2641 = vmatprep.subr.bf16.mxu1 %v791_v13 }
 0x367   :  { %2642 = vmatpush3.bf16.msra.mxu1 %v791_v13 }
 0x368   :  { %2643 = vmatprep.subr.bf16.mxu1 %v790_v14 }
 0x36b   :  { %2644 = vmatpush3.bf16.msra.mxu1 %v790_v14 }
 0x36c   :  { %2645 = vmatprep.subr.bf16.mxu1 %v789_v15 }
 0x36f   :  { %2646 = vmatpush3.bf16.msra.mxu1 %v789_v15 }
 0x370   :  { %2647 = vmatprep.subr.bf16.mxu1 %v788_v16 }
 0x373   :  { %2648 = vmatpush3.bf16.msra.mxu1 %v788_v16 }
 0x374   :  { %2649 = vmatprep.subr.bf16.mxu1 %v787_v17 }
 0x377   :  { %2650 = vmatpush3.bf16.msra.mxu1 %v787_v17 }
 0x37a   :  { %2652 = vmatmul.mubr.bf16.vlgmr.msra.gmra.mxu1 %v3542_v43  ;;  %v2913_v43 = vld [vmem:[#allocation10 + $0x10] sm:$0xff]  }
 0x37b   :  { %2655 = vmatprep.mubr.bf16.mxu1 %v3544_v44  ;;  %2677 = vmatprep.subr.bf16.mxu0 %v2913_v43  ;;  %v2914_v44 = vld [vmem:[#allocation10 + $0x8] sm:$0xff]  }
 0x37c   :  { %2678 = vmatpush3.bf16.msra.mxu0 %v2913_v43 }
 0x37d   :  { %2679 = vmatprep.subr.bf16.mxu0 %v2914_v44 }
 0x380   :  { %2680 = vmatpush3.bf16.msra.mxu0 %v2914_v44  ;;  %v2921_v44 = vld [vmem:[#allocation11 + $0x10] sm:$0xff]  }
 0x382   :  { %2656 = vmatmul.mubr.bf16.gmra.mxu1 %v3548_v45  ;;  %v2915_v45 = vld [vmem:[#allocation10] sm:$0xff]  }
 0x383   :  { %2659 = vmatprep.mubr.bf16.mxu1 %v3550_v46  ;;  %2681 = vmatprep.subr.bf16.mxu0 %v2915_v45  ;;  %v2916_v46 = vld [vmem:[#allocation11 + $0x38] sm:$0xff]  }
 0x384   :  { %2682 = vmatpush3.bf16.msra.mxu0 %v2915_v45  ;;  %2699 = vmatprep.subr.bf16.mxu1 %v2916_v46  ;;  %v2922_v45 = vld [vmem:[#allocation11 + $0x8] sm:$0xff]  }
 0x385   :  { %2700 = vmatpush3.bf16.msra.mxu1 %v2916_v46  ;;  %v2923_v46 = vld [vmem:[#allocation11] sm:$0xff]  }
 0x38a   :  { %2660 = vmatmul.mubr.bf16.gmra.mxu1 %v3554_v47  ;;  %v2917_v47 = vld [vmem:[#allocation11 + $0x30] sm:$0xff]  }
 0x38b   :  { %2663 = vmatprep.mubr.bf16.mxu1 %v3556_v48  ;;  %2701 = vmatprep.subr.bf16.mxu1 %v2917_v47  ;;  %v2918_v48 = vld [vmem:[#allocation11 + $0x28] sm:$0xff]  }
 0x38c   :  { %2702 = vmatpush3.bf16.msra.mxu1 %v2917_v47  ;;  %v2924_v47 = vld [vmem:[#allocation14 + $0x38] sm:$0xff]  }
 0x38d   :  { %2703 = vmatprep.subr.bf16.mxu1 %v2918_v48 }
 0x390   :  { %2704 = vmatpush3.bf16.msra.mxu1 %v2918_v48  ;;  %v2932_v48 = vld [vmem:[#allocation13 + $0x38] sm:$0xff]  }
 0x391   :  { %2731 = vmatprep.subr.bf16.mxu0 %v2932_v48 }
 0x392   :  { %2664 = vmatmul.mubr.bf16.gmra.mxu1 %v3560_v49  ;;  %v2919_v49 = vld [vmem:[#allocation11 + $0x20] sm:$0xff]  }
 0x393   :  { %2705 = vmatprep.subr.bf16.mxu1 %v2919_v49 }
 0x394   :  { %2706 = vmatpush3.bf16.msra.mxu1 %v2919_v49  ;;  %v2933_v49 = vld [vmem:[#allocation13 + $0x30] sm:$0xff]  }
 0x395   :  { %2707 = vmatprep.subr.bf16.mxu1 %v2920_v21 }
 0x398   :  { %2708 = vmatpush3.bf16.msra.mxu1 %v2920_v21  ;;  %v2934_v21 = vld [vmem:[#allocation13 + $0x28] sm:$0xff]  }
 0x399   :  { %2709 = vmatprep.subr.bf16.mxu1 %v2921_v44 }
 0x39c   :  { %2710 = vmatpush3.bf16.msra.mxu1 %v2921_v44 }
 0x39d   :  { %2711 = vmatprep.subr.bf16.mxu1 %v2922_v45 }
 0x3a0   :  { %2712 = vmatpush3.bf16.msra.mxu1 %v2922_v45 }
 0x3a1   :  { %2713 = vmatprep.subr.bf16.mxu1 %v2923_v46 }
 0x3a4   :  { %2714 = vmatpush3.bf16.msra.mxu1 %v2923_v46 }
 0x3a5   :  { %2763 = vmatprep.subr.bf16.mxu1 %v2924_v47 }
 0x43a   :  { %v2653_v23 = vpop.f32.mrf.mxu1 }
 0x43b   :  { %v845_v24 = vadd.f32 %v2653_v23, %v3576_v22  ;;  %v2936_v23 = vld [vmem:[#allocation13 + $0x18] sm:$0xff]  }
 0x43c   :  { %v836_v25 = vpop.f32.mrf.mxu1 }
 0x43d   :  { %2988 = vtanh.f32 %v845_v24  ;;  %v837_v26 = vadd.f32 %v3576_v22, %v836_v25 }
 0x43e   :  { %v2654_v27 = vpop.f32.mrf.mxu1 }
 0x43f   :  { %2990 = vtanh.f32 %v837_v26  ;;  %v848_v28 = vadd.f32 %v2654_v27, %v3576_v22  ;;  %v3621_v26 = vld [vmem:[%s3886_s7] ss:$0 sm:$0xff] }
 0x440   :  { %v839_v29 = vpop.f32.mrf.mxu1 }
 0x441   :  { %2992 = vtanh.f32 %v848_v28  ;;  %v840_v30 = vadd.f32 %v3576_v22, %v839_v29 }
 0x442   :  { %v2657_v31 = vpop.f32.mrf.mxu1 }
 0x443   :  { %2994 = vtanh.f32 %v840_v30  ;;  %v861_v32 = vadd.f32 %v2657_v31, %v3576_v22 }
 0x444   :  { %v852_v33 = vpop.f32.mrf.mxu1 }
 0x445   :  { %2996 = vtanh.f32 %v861_v32  ;;  %v853_v34 = vadd.f32 %v3576_v22, %v852_v33 }
 0x446   :  { %v2658_v35 = vpop.f32.mrf.mxu1 }
 0x447   :  { %2998 = vtanh.f32 %v853_v34  ;;  %v864_v36 = vadd.f32 %v2658_v35, %v3576_v22 }
 0x448   :  { %v855_v37 = vpop.f32.mrf.mxu1 }
 0x449   :  { %3000 = vtanh.f32 %v864_v36  ;;  %v856_v38 = vadd.f32 %v3576_v22, %v855_v37 }
 0x44a   :  { %v2989_v39 = vpop.eup %2988  ;;  %v2661_v40 = vpop.f32.mrf.mxu1 }
 0x44b   :  { %925 = vst [vmem:[#allocation22 + $0x10] sm:$0xff] %v2989_v39  ;;  %3002 = vtanh.f32 %v856_v38  ;;  %v877_v41 = vadd.f32 %v2661_v40, %v3576_v22 }
 0x44c   :  { %v2991_v42 = vpop.eup %2990  ;;  %v868_v50 = vpop.f32.mrf.mxu1 }
 0x44d   :  { %923 = vst [vmem:[#allocation22] sm:$0xff] %v2991_v42  ;;  %3004 = vtanh.f32 %v877_v41  ;;  %v869_v51 = vadd.f32 %v3576_v22, %v868_v50 }
 0x44e   :  { %v2993_v52 = vpop.eup %2992  ;;  %v2662_v53 = vpop.f32.mrf.mxu1 }
 0x44f   :  { %926 = vst [vmem:[#allocation22 + $0x18] sm:$0xff] %v2993_v52  ;;  %3006 = vtanh.f32 %v869_v51  ;;  %v880_v54 = vadd.f32 %v2662_v53, %v3576_v22  ;;  %v3592_v61 = vpack.c.bf16 %v2993_v52, %v2989_v39 }
 0x450   :  { %v2995_v55 = vpop.eup %2994  ;;  %v871_v56 = vpop.f32.mrf.mxu1 }
 0x451   :  { %924 = vst [vmem:[#allocation22 + $0x8] sm:$0xff] %v2995_v55  ;;  %3008 = vtanh.f32 %v880_v54  ;;  %v872_v57 = vadd.f32 %v3576_v22, %v871_v56  ;;  %v3590_v58 = vpack.c.bf16 %v2995_v55, %v2991_v42  ;;  %v2925_v42 = vld [vmem:[#allocation14 + $0x30] sm:$0xff]  }
 0x452   :  { %v2997_v59 = vpop.eup %2996  ;;  %v2665_v60 = vpop.f32.mrf.mxu1 }
 0x453   :  { %929 = vst [vmem:[#allocation22 + $0x30] sm:$0xff] %v2997_v59  ;;  %3010 = vtanh.f32 %v872_v57  ;;  %v893_v62 = vadd.f32 %v2665_v60, %v3576_v22  ;;  %2683 = vmatprep.mubr.bf16.mxu0 %v3590_v58  ;;  %v2926_v57 = vld [vmem:[#allocation14 + $0x28] sm:$0xff]  }
 0x454   :  { %v2999_v63 = vpop.eup %2998  ;;  %v884_v0 = vpop.f32.mrf.mxu1  ;;  %2684 = vmatmul.mubr.bf16.vlgmr.msra.gmra.mxu0 %v3592_v61 }
 0x455   :  { %927 = vst [vmem:[#allocation22 + $0x20] sm:$0xff] %v2999_v63  ;;  %3012 = vtanh.f32 %v893_v62  ;;  %v885_v1 = vadd.f32 %v3576_v22, %v884_v0  ;;  %2732 = vmatpush3.bf16.msra.mxu0 %v2932_v48 }
 0x456   :  { %v3001_v2 = vpop.eup %3000  ;;  %v2666_v3 = vpop.f32.mrf.mxu1  ;;  %2733 = vmatprep.subr.bf16.mxu0 %v2933_v49 }
 0x457   :  { %930 = vst [vmem:[#allocation22 + $0x38] sm:$0xff] %v3001_v2  ;;  %3014 = vtanh.f32 %v885_v1  ;;  %v896_v4 = vadd.f32 %v2666_v3, %v3576_v22  ;;  %v3602_v10 = vpack.c.bf16 %v3001_v2, %v2997_v59  ;;  %v2927_v3 = vld [vmem:[#allocation14 + $0x20] sm:$0xff]  }
 0x458   :  { %v3003_v5 = vpop.eup %3002  ;;  %v887_v6 = vpop.f32.mrf.mxu1 }
 0x459   :  { %928 = vst [vmem:[#allocation22 + $0x28] sm:$0xff] %v3003_v5  ;;  %3016 = vtanh.f32 %v896_v4  ;;  %v888_v7 = vadd.f32 %v3576_v22, %v887_v6  ;;  %v3600_v8 = vpack.c.bf16 %v3003_v5, %v2999_v63  ;;  %2734 = vmatpush3.bf16.msra.mxu0 %v2933_v49  ;;  %v2935_v22 = vld [vmem:[#allocation13 + $0x20] sm:$0xff]  }
 0x45a   :  { %v3005_v9 = vpop.eup %3004  ;;  %2735 = vmatprep.subr.bf16.mxu0 %v2934_v21 }
 0x45b   :  { %933 = vst [vmem:[#allocation22 + $0x50] sm:$0xff] %v3005_v9  ;;  %3018 = vtanh.f32 %v888_v7  ;;  %2687 = vmatprep.mubr.bf16.mxu0 %v3600_v8 }
 0x45c   :  { %v3007_v11 = vpop.eup %3006  ;;  %2688 = vmatmul.mubr.bf16.gmra.mxu0 %v3602_v10 }
 0x45d   :  { %931 = vst [vmem:[#allocation22 + $0x40] sm:$0xff] %v3007_v11  ;;  %2736 = vmatpush3.bf16.msra.mxu0 %v2934_v21 }
 0x45e   :  { %v3009_v12 = vpop.eup %3008  ;;  %2737 = vmatprep.subr.bf16.mxu0 %v2935_v22 }
 0x45f   :  { %934 = vst [vmem:[#allocation22 + $0x58] sm:$0xff] %v3009_v12  ;;  %v3608_v16 = vpack.c.bf16 %v3009_v12, %v3005_v9 }
 0x460   :  { %v3011_v13 = vpop.eup %3010 }
 0x461   :  { %932 = vst [vmem:[#allocation22 + $0x48] sm:$0xff] %v3011_v13  ;;  %v3606_v14 = vpack.c.bf16 %v3011_v13, %v3007_v11  ;;  %2738 = vmatpush3.bf16.msra.mxu0 %v2935_v22  ;;  %v2928_v13 = vld [vmem:[#allocation14 + $0x18] sm:$0xff]  }
 0x462   :  { %v3013_v15 = vpop.eup %3012  ;;  %2739 = vmatprep.subr.bf16.mxu0 %v2936_v23 }
 0x463   :  { %937 = vst [vmem:[#allocation22 + $0x70] sm:$0xff] %v3013_v15  ;;  %2691 = vmatprep.mubr.bf16.mxu0 %v3606_v14 }
 0x464   :  { %v3015_v17 = vpop.eup %3014  ;;  %2692 = vmatmul.mubr.bf16.gmra.mxu0 %v3608_v16 }
 0x465   :  { %935 = vst [vmem:[#allocation22 + $0x60] sm:$0xff] %v3015_v17  ;;  %2740 = vmatpush3.bf16.msra.mxu0 %v2936_v23 }
 0x466   :  { %v3017_v18 = vpop.eup %3016 }
 0x467   :  { %938 = vst [vmem:[#allocation22 + $0x78] sm:$0xff] %v3017_v18  ;;  %v3614_v43 = vpack.c.bf16 %v3017_v18, %v3013_v15 }
 0x468   :  { %v3019_v19 = vpop.eup %3018 }
 0x469   :  { %936 = vst [vmem:[#allocation22 + $0x68] sm:$0xff] %v3019_v19  ;;  %v3612_v20 = vpack.c.bf16 %v3019_v19, %v3015_v17 }
 0x46b   :  { %2695 = vmatprep.mubr.bf16.mxu0 %v3612_v20 }
 0x46c   :  { %2696 = vmatmul.mubr.bf16.gmra.mxu0 %v3614_v43 }
 0x514   :  { %v2685_v24 = vpop.f32.mrf.mxu0 }
 0x515   :  { %v1053_v30 = vadd.f32 %v2685_v24, %v3621_v26 }
 0x516   :  { %v1044_v25 = vpop.f32.mrf.mxu0 }
 0x517   :  { %v1045_v28 = vadd.f32 %v3621_v26, %v1044_v25  ;;  %v1109_v37 = vmax.f32 %v1053_v30, 0.0  ;;  %v2930_v25 = vld [vmem:[#allocation14 + $0x8] sm:$0xff]  }
 0x518   :  { %v2686_v27 = vpop.f32.mrf.mxu0 }
 0x519   :  { %v1056_v29 = vadd.f32 %v2686_v27, %v3621_v26  ;;  %v1107_v35 = vmax.f32 %v1045_v28, 0.0 }
 0x51a   :  { %v1047_v31 = vpop.f32.mrf.mxu0 }
 0x51b   :  { %v1048_v32 = vadd.f32 %v3621_v26, %v1047_v31  ;;  %v1110_v33 = vmax.f32 %v1056_v29, 0.0 }
 0x51c   :  { %v2689_v34 = vpop.f32.mrf.mxu0 }
 0x51d   :  { %v1108_v36 = vmax.f32 %v1048_v32, 0.0  ;;  %v1124_v40 = vpack.c.bf16 %v1110_v33, %v1109_v37  ;;  %v1069_v52 = vadd.f32 %v2689_v34, %v3621_v26  ;;  %v2931_v32 = vld [vmem:[#allocation14] sm:$0xff]  }
 0x51e   :  { %v1060_v38 = vpop.f32.mrf.mxu0  ;;  %v2939_v33 = vld [vmem:[#allocation13] sm:$0xff]  }
 0x51f   :  { %v1123_v39 = vpack.c.bf16 %v1108_v36, %v1107_v35  ;;  %v1061_v50 = vadd.f32 %v3621_v26, %v1060_v38  ;;  %v1113_v62 = vmax.f32 %v1069_v52, 0.0 }
 0x520   :  { %v2690_v41 = vpop.f32.mrf.mxu0 }
 0x521   :  { %v1072_v51 = vadd.f32 %v2690_v41, %v3621_v26  ;;  %2715 = vmatprep.mubr.bf16.mxu1 %v1123_v39  ;;  %v1111_v59 = vmax.f32 %v1061_v50, 0.0 }
 0x522   :  { %v1063_v53 = vpop.f32.mrf.mxu0  ;;  %2716 = vmatmul.mubr.bf16.vlgmr.msra.gmra.mxu1 %v1124_v40 }
 0x523   :  { %v1064_v54 = vadd.f32 %v3621_v26, %v1063_v53  ;;  %2764 = vmatpush3.bf16.msra.mxu1 %v2924_v47  ;;  %v1114_v55 = vmax.f32 %v1072_v51, 0.0  ;;  %v2929_v47 = vld [vmem:[#allocation14 + $0x10] sm:$0xff]  }
 0x524   :  { %v2693_v56 = vpop.f32.mrf.mxu0  ;;  %2765 = vmatprep.subr.bf16.mxu1 %v2925_v42  ;;  %v2941_v53 = vld [vmem:[#allocation16 + $0x30] sm:$0xff]  }
 0x525   :  { %v1112_v60 = vmax.f32 %v1064_v54, 0.0  ;;  %v1126_v1 = vpack.c.bf16 %v1114_v55, %v1113_v62  ;;  %v1085_v6 = vadd.f32 %v2693_v56, %v3621_v26 }
 0x526   :  { %v1076_v63 = vpop.f32.mrf.mxu0 }
 0x527   :  { %v1125_v0 = vpack.c.bf16 %v1112_v60, %v1111_v59  ;;  %2766 = vmatpush3.bf16.msra.mxu1 %v2925_v42  ;;  %v1077_v4 = vadd.f32 %v3621_v26, %v1076_v63  ;;  %v1117_v18 = vmax.f32 %v1085_v6, 0.0  ;;  %v2942_v63 = vld [vmem:[#allocation16 + $0x28] sm:$0xff]  }
 0x528   :  { %v2694_v2 = vpop.f32.mrf.mxu0  ;;  %2767 = vmatprep.subr.bf16.mxu1 %v2926_v57 }
 0x529   :  { %v1088_v5 = vadd.f32 %v2694_v2, %v3621_v26  ;;  %2719 = vmatprep.mubr.bf16.mxu1 %v1125_v0  ;;  %v1115_v15 = vmax.f32 %v1077_v4, 0.0 }
 0x52a   :  { %v1079_v7 = vpop.f32.mrf.mxu0  ;;  %2720 = vmatmul.mubr.bf16.gmra.mxu1 %v1126_v1 }
 0x52b   :  { %v1080_v9 = vadd.f32 %v3621_v26, %v1079_v7  ;;  %2768 = vmatpush3.bf16.msra.mxu1 %v2926_v57  ;;  %v1118_v11 = vmax.f32 %v1088_v5, 0.0  ;;  %v2943_v7 = vld [vmem:[#allocation16 + $0x20] sm:$0xff]  }
 0x52c   :  { %v2697_v12 = vpop.f32.mrf.mxu0  ;;  %2769 = vmatprep.subr.bf16.mxu1 %v2927_v3 }
 0x52d   :  { %v1116_v17 = vmax.f32 %v1080_v9, 0.0  ;;  %v1128_v45 = vpack.c.bf16 %v1118_v11, %v1117_v18  ;;  %v1101_v21 = vadd.f32 %v2697_v12, %v3621_v26 }
 0x52e   :  { %v1092_v19 = vpop.f32.mrf.mxu0 }
 0x52f   :  { %v1127_v44 = vpack.c.bf16 %v1116_v17, %v1115_v15  ;;  %2770 = vmatpush3.bf16.msra.mxu1 %v2927_v3  ;;  %v1093_v48 = vadd.f32 %v3621_v26, %v1092_v19  ;;  %v1121_v29 = vmax.f32 %v1101_v21, 0.0  ;;  %v2944_v19 = vld [vmem:[#allocation16 + $0x18] sm:$0xff]  }
 0x530   :  { %v2698_v46 = vpop.f32.mrf.mxu0  ;;  %2771 = vmatprep.subr.bf16.mxu1 %v2928_v13 }
 0x531   :  { %v1104_v49 = vadd.f32 %v2698_v46, %v3621_v26  ;;  %2723 = vmatprep.mubr.bf16.mxu1 %v1127_v44  ;;  %v1119_v27 = vmax.f32 %v1093_v48, 0.0 }
 0x532   :  { %v1095_v22 = vpop.f32.mrf.mxu0  ;;  %2724 = vmatmul.mubr.bf16.gmra.mxu1 %v1128_v45 }
 0x533   :  { %v1096_v23 = vadd.f32 %v3621_v26, %v1095_v22  ;;  %2772 = vmatpush3.bf16.msra.mxu1 %v2928_v13  ;;  %v1122_v24 = vmax.f32 %v1104_v49, 0.0  ;;  %v2937_v26 = vld [vmem:[#allocation13 + $0x10] sm:$0xff]  }
 0x534   :  { %2773 = vmatprep.subr.bf16.mxu1 %v2929_v47  ;;  %2741 = vmatprep.subr.bf16.mxu0 %v2937_v26  ;;  %v2945_v22 = vld [vmem:[#allocation16 + $0x10] sm:$0xff]  }
 0x535   :  { %v1120_v28 = vmax.f32 %v1096_v23, 0.0  ;;  %v1130_v31 = vpack.c.bf16 %v1122_v24, %v1121_v29  ;;  %2742 = vmatpush3.bf16.msra.mxu0 %v2937_v26 }
 0x537   :  { %v1129_v30 = vpack.c.bf16 %v1120_v28, %v1119_v27  ;;  %2774 = vmatpush3.bf16.msra.mxu1 %v2929_v47 }
 0x538   :  { %2775 = vmatprep.subr.bf16.mxu1 %v2930_v25 }
 0x539   :  { %2727 = vmatprep.mubr.bf16.mxu1 %v1129_v30 }
 0x53a   :  { %2728 = vmatmul.mubr.bf16.gmra.mxu1 %v1130_v31  ;;  %v2946_v31 = vld [vmem:[#allocation16 + $0x8] sm:$0xff]  }
 0x53b   :  { %2776 = vmatpush3.bf16.msra.mxu1 %v2930_v25  ;;  %2779 = vmatprep.mubr.bf16.mxu1 %v3590_v58  ;;  %v2938_v58 = vld [vmem:[#allocation13 + $0x8] sm:$0xff]  }
 0x53c   :  { %2777 = vmatprep.subr.bf16.mxu1 %v2931_v32  ;;  %2743 = vmatprep.subr.bf16.mxu0 %v2938_v58 }
 0x53d   :  { %2744 = vmatpush3.bf16.msra.mxu0 %v2938_v58 }
 0x53e   :  { %2745 = vmatprep.subr.bf16.mxu0 %v2939_v33 }
 0x53f   :  { %2778 = vmatpush3.bf16.msra.mxu1 %v2931_v32 }
 0x541   :  { %2746 = vmatpush3.bf16.msra.mxu0 %v2939_v33 }
 0x542   :  { %2780 = vmatmul.mubr.bf16.vlgmr.msra.gmra.mxu1 %v3592_v61  ;;  %v2940_v61 = vld [vmem:[#allocation16 + $0x38] sm:$0xff]  }
 0x543   :  { %2783 = vmatprep.mubr.bf16.mxu1 %v3600_v8  ;;  %2795 = vmatprep.subr.bf16.mxu0 %v2940_v61 }
 0x54a   :  { %2784 = vmatmul.mubr.bf16.gmra.mxu1 %v3602_v10 }
 0x54b   :  { %2787 = vmatprep.mubr.bf16.mxu1 %v3606_v14  ;;  %v3650_v14 = vld [vmem:[%s3888_s9] ss:$0 sm:$0xff] }
 0x552   :  { %2788 = vmatmul.mubr.bf16.gmra.mxu1 %v3608_v16 }
 0x553   :  { %2791 = vmatprep.mubr.bf16.mxu1 %v3612_v20 }
 0x55a   :  { %2792 = vmatmul.mubr.bf16.gmra.mxu1 %v3614_v43 }
 0x5e2   :  { %v2717_v8 = vpop.f32.mrf.mxu1 }
 0x5e3   :  { %v1245_v34 = vadd.f32 %v2717_v8, %v3650_v14  ;;  %v3671_v8 = vld [vmem:[%s3892_s13] ss:$0 sm:$0xff] }
 0x5e4   :  { %v1236_v10 = vpop.f32.mrf.mxu1 }
 0x5e5   :  { %v1237_v20 = vadd.f32 %v3650_v14, %v1236_v10  ;;  %v1301_v41 = vmax.f32 %v1245_v34, 0.0 }
 0x5e6   :  { %v2718_v16 = vpop.f32.mrf.mxu1 }
 0x5e7   :  { %v1248_v43 = vadd.f32 %v2718_v16, %v3650_v14  ;;  %v1299_v39 = vmax.f32 %v1237_v20, 0.0 }
 0x5e8   :  { %v1239_v35 = vpop.f32.mrf.mxu1 }
 0x5e9   :  { %v1240_v36 = vadd.f32 %v3650_v14, %v1239_v35  ;;  %v1302_v37 = vmax.f32 %v1248_v43, 0.0 }
 0x5ea   :  { %v2721_v38 = vpop.f32.mrf.mxu1 }
 0x5eb   :  { %v1300_v40 = vmax.f32 %v1240_v36, 0.0  ;;  %v1316_v51 = vpack.c.bf16 %v1302_v37, %v1301_v41  ;;  %v1261_v56 = vadd.f32 %v2721_v38, %v3650_v14 }
 0x5ec   :  { %v1252_v42 = vpop.f32.mrf.mxu1 }
 0x5ed   :  { %v1315_v50 = vpack.c.bf16 %v1300_v40, %v1299_v39  ;;  %v1253_v54 = vadd.f32 %v3650_v14, %v1252_v42  ;;  %v1305_v2 = vmax.f32 %v1261_v56, 0.0 }
 0x5ee   :  { %v2722_v52 = vpop.f32.mrf.mxu1 }
 0x5ef   :  { %v1264_v55 = vadd.f32 %v2722_v52, %v3650_v14  ;;  %2747 = vmatprep.mubr.bf16.mxu0 %v1315_v50  ;;  %v1303_v0 = vmax.f32 %v1253_v54, 0.0 }
 0x5f0   :  { %v1255_v57 = vpop.f32.mrf.mxu1  ;;  %2748 = vmatmul.mubr.bf16.vlgmr.msra.gmra.mxu0 %v1316_v51 }
 0x5f1   :  { %v1256_v59 = vadd.f32 %v3650_v14, %v1255_v57  ;;  %2796 = vmatpush3.bf16.msra.mxu0 %v2940_v61  ;;  %v1306_v60 = vmax.f32 %v1264_v55, 0.0 }
 0x5f2   :  { %v2725_v62 = vpop.f32.mrf.mxu1  ;;  %2797 = vmatprep.subr.bf16.mxu0 %v2941_v53 }
 0x5f3   :  { %v1304_v1 = vmax.f32 %v1256_v59, 0.0  ;;  %v1318_v5 = vpack.c.bf16 %v1306_v60, %v1305_v2  ;;  %v1277_v12 = vadd.f32 %v2725_v62, %v3650_v14 }
 0x5f4   :  { %v1268_v3 = vpop.f32.mrf.mxu1 }
 0x5f5   :  { %v1317_v4 = vpack.c.bf16 %v1304_v1, %v1303_v0  ;;  %2798 = vmatpush3.bf16.msra.mxu0 %v2941_v53  ;;  %v1269_v9 = vadd.f32 %v3650_v14, %v1268_v3  ;;  %v1309_v46 = vmax.f32 %v1277_v12, 0.0 }
 0x5f6   :  { %v2726_v6 = vpop.f32.mrf.mxu1  ;;  %2799 = vmatprep.subr.bf16.mxu0 %v2942_v63 }
 0x5f7   :  { %v1280_v11 = vadd.f32 %v2726_v6, %v3650_v14  ;;  %2751 = vmatprep.mubr.bf16.mxu0 %v1317_v4  ;;  %v1307_v44 = vmax.f32 %v1269_v9, 0.0 }
 0x5f8   :  { %v1271_v13 = vpop.f32.mrf.mxu1  ;;  %2752 = vmatmul.mubr.bf16.gmra.mxu0 %v1318_v5 }
 0x5f9   :  { %v1272_v15 = vadd.f32 %v3650_v14, %v1271_v13  ;;  %2800 = vmatpush3.bf16.msra.mxu0 %v2942_v63  ;;  %v1310_v17 = vmax.f32 %v1280_v11, 0.0 }
 0x5fa   :  { %v2729_v18 = vpop.f32.mrf.mxu1  ;;  %2801 = vmatprep.subr.bf16.mxu0 %v2943_v7 }
 0x5fb   :  { %v1308_v45 = vmax.f32 %v1272_v15, 0.0  ;;  %v1320_v49 = vpack.c.bf16 %v1310_v17, %v1309_v46  ;;  %v1293_v25 = vadd.f32 %v2729_v18, %v3650_v14 }
 0x5fc   :  { %v1284_v47 = vpop.f32.mrf.mxu1 }
 0x5fd   :  { %v1319_v48 = vpack.c.bf16 %v1308_v45, %v1307_v44  ;;  %2802 = vmatpush3.bf16.msra.mxu0 %v2943_v7  ;;  %v1285_v23 = vadd.f32 %v3650_v14, %v1284_v47  ;;  %v1313_v58 = vmax.f32 %v1293_v25, 0.0 }
 0x5fe   :  { %v2730_v21 = vpop.f32.mrf.mxu1  ;;  %2803 = vmatprep.subr.bf16.mxu0 %v2944_v19 }
 0x5ff   :  { %v1296_v24 = vadd.f32 %v2730_v21, %v3650_v14  ;;  %2755 = vmatprep.mubr.bf16.mxu0 %v1319_v48  ;;  %v1311_v32 = vmax.f32 %v1285_v23, 0.0 }
 0x600   :  { %v1287_v27 = vpop.f32.mrf.mxu1  ;;  %2756 = vmatmul.mubr.bf16.gmra.mxu0 %v1320_v49 }
 0x601   :  { %v1288_v28 = vadd.f32 %v3650_v14, %v1287_v27  ;;  %2804 = vmatpush3.bf16.msra.mxu0 %v2944_v19  ;;  %v1314_v29 = vmax.f32 %v1296_v24, 0.0  ;;  %v2947_v14 = vld [vmem:[#allocation16] sm:$0xff]  }
 0x602   :  { %v2781_v30 = vpop.f32.mrf.mxu1  ;;  %2805 = vmatprep.subr.bf16.mxu0 %v2945_v22 }
 0x603   :  { %v1312_v26 = vmax.f32 %v1288_v28, 0.0  ;;  %v1322_v10 = vpack.c.bf16 %v1314_v29, %v1313_v58  ;;  %v1784_v34 = vadd.f32 %v2781_v30, %v3671_v8  ;;  %v2948_v30 = vld [vmem:[#allocation17 + $0x38] sm:$0xff]  }
 0x604   :  { %v1775_v33 = vpop.f32.mrf.mxu1  ;;  %2827 = vmatprep.subr.bf16.mxu1 %v2948_v30  ;;  %v2952_v58 = vld [vmem:[#allocation17 + $0x18] sm:$0xff]  }
 0x605   :  { %v1321_v61 = vpack.c.bf16 %v1312_v26, %v1311_v32  ;;  %2806 = vmatpush3.bf16.msra.mxu0 %v2945_v22  ;;  %v1776_v20 = vadd.f32 %v3671_v8, %v1775_v33  ;;  %v1840_v41 = vmax.f32 %v1784_v34, 0.0  ;;  %2828 = vmatpush3.bf16.msra.mxu1 %v2948_v30  ;;  %v2950_v32 = vld [vmem:[#allocation17 + $0x28] sm:$0xff]   ;;  %v2951_v26 = vld [vmem:[#allocation17 + $0x20] sm:$0xff]   ;;  %v2953_v33 = vld [vmem:[#allocation17 + $0x10] sm:$0xff]  }
 0x606   :  { %v2782_v16 = vpop.f32.mrf.mxu1  ;;  %2807 = vmatprep.subr.bf16.mxu0 %v2946_v31 }
 0x607   :  { %v1787_v43 = vadd.f32 %v2782_v16, %v3671_v8  ;;  %2759 = vmatprep.mubr.bf16.mxu0 %v1321_v61  ;;  %v1838_v39 = vmax.f32 %v1776_v20, 0.0  ;;  %v2954_v61 = vld [vmem:[#allocation17 + $0x8] sm:$0xff]  }
 0x608   :  { %2760 = vmatmul.mubr.bf16.gmra.mxu0 %v1322_v10  ;;  %v1778_v35 = vpop.f32.mrf.mxu1  ;;  %v1491_v10 = vlaneseq }
 0x609   :  { %v1779_v36 = vadd.f32 %v3671_v8, %v1778_v35  ;;  %2808 = vmatpush3.bf16.msra.mxu0 %v2946_v31  ;;  %v1841_v37 = vmax.f32 %v1787_v43, 0.0  ;;  %v2949_v31 = vld [vmem:[#allocation17 + $0x30] sm:$0xff]  }
 0x60a   :  { %v2785_v38 = vpop.f32.mrf.mxu1  ;;  %2809 = vmatprep.subr.bf16.mxu0 %v2947_v14  ;;  %2829 = vmatprep.subr.bf16.mxu1 %v2949_v31  ;;  %v3689_v16 = vand.u32 127, %v1491_v10 }
 0x60b   :  { %v1839_v40 = vmax.f32 %v1779_v36, 0.0  ;;  %v1855_v51 = vpack.c.bf16 %v1841_v37, %v1840_v41  ;;  %v1800_v55 = vadd.f32 %v2785_v38, %v3671_v8  ;;  %2830 = vmatpush3.bf16.msra.mxu1 %v2949_v31 }
 0x60c   :  { %v1791_v42 = vpop.f32.mrf.mxu1  ;;  %2831 = vmatprep.subr.bf16.mxu1 %v2950_v32  ;;  %vm1493_vm0 = vcmp.lt.s32.totalorder %v3689_v16, 4 }
 0x60d   :  { %v1854_v50 = vpack.c.bf16 %v1839_v40, %v1838_v39  ;;  %2810 = vmatpush3.bf16.msra.mxu0 %v2947_v14  ;;  %v1792_v53 = vadd.f32 %v3671_v8, %v1791_v42  ;;  %v1844_v0 = vmax.f32 %v1800_v55, 0.0  ;;  %v2343_v14 = vld [vmem:[%s3890_s11] ss:$0 sm:$0xff] }
 0x60e   :  { %v2786_v52 = vpop.f32.mrf.mxu1 }
 0x60f   :  { %v1803_v54 = vadd.f32 %v2786_v52, %v3671_v8  ;;  %2811 = vmatprep.mubr.bf16.mxu0 %v1854_v50  ;;  %v1842_v62 = vmax.f32 %v1792_v53, 0.0  ;;  %2832 = vmatpush3.bf16.msra.mxu1 %v2950_v32 }
 0x610   :  { %v1794_v56 = vpop.f32.mrf.mxu1  ;;  %2812 = vmatmul.mubr.bf16.vlgmr.msra.gmra.mxu0 %v1855_v51  ;;  %2833 = vmatprep.subr.bf16.mxu1 %v2951_v26 }
 0x611   :  { %v1795_v57 = vadd.f32 %v3671_v8, %v1794_v56  ;;  %v1845_v59 = vmax.f32 %v1803_v54, 0.0 }
 0x612   :  { %v2789_v60 = vpop.f32.mrf.mxu1 }
 0x613   :  { %v1843_v63 = vmax.f32 %v1795_v57, 0.0  ;;  %v1857_v3 = vpack.c.bf16 %v1845_v59, %v1844_v0  ;;  %v1816_v7 = vadd.f32 %v2789_v60, %v3671_v8  ;;  %2834 = vmatpush3.bf16.msra.mxu1 %v2951_v26 }
 0x614   :  { %v1807_v1 = vpop.f32.mrf.mxu1  ;;  %2835 = vmatprep.subr.bf16.mxu1 %v2952_v58 }
 0x615   :  { %v1856_v2 = vpack.c.bf16 %v1843_v63, %v1842_v62  ;;  %v1808_v5 = vadd.f32 %v3671_v8, %v1807_v1  ;;  %v1848_v18 = vmax.f32 %v1816_v7, 0.0 }
 0x616   :  { %v2790_v4 = vpop.f32.mrf.mxu1 }
 0x617   :  { %v1819_v6 = vadd.f32 %v2790_v4, %v3671_v8  ;;  %2815 = vmatprep.mubr.bf16.mxu0 %v1856_v2  ;;  %v1846_v15 = vmax.f32 %v1808_v5, 0.0  ;;  %2836 = vmatpush3.bf16.msra.mxu1 %v2952_v58 }
 0x618   :  { %v1810_v9 = vpop.f32.mrf.mxu1  ;;  %2816 = vmatmul.mubr.bf16.gmra.mxu0 %v1857_v3  ;;  %2837 = vmatprep.subr.bf16.mxu1 %v2953_v33 }
 0x619   :  { %v1811_v11 = vadd.f32 %v3671_v8, %v1810_v9  ;;  %v1849_v12 = vmax.f32 %v1819_v6, 0.0 }
 0x61a   :  { %v2793_v13 = vpop.f32.mrf.mxu1 }
 0x61b   :  { %v1847_v17 = vmax.f32 %v1811_v11, 0.0  ;;  %v1859_v45 = vpack.c.bf16 %v1849_v12, %v1848_v18  ;;  %v1832_v49 = vadd.f32 %v2793_v13, %v3671_v8  ;;  %2838 = vmatpush3.bf16.msra.mxu1 %v2953_v33 }
 0x61c   :  { %v1823_v19 = vpop.f32.mrf.mxu1  ;;  %2839 = vmatprep.subr.bf16.mxu1 %v2954_v61 }
 0x61d   :  { %v1858_v44 = vpack.c.bf16 %v1847_v17, %v1846_v15  ;;  %v1824_v47 = vadd.f32 %v3671_v8, %v1823_v19  ;;  %v1852_v27 = vmax.f32 %v1832_v49, 0.0 }
 0x61e   :  { %v2794_v46 = vpop.f32.mrf.mxu1 }
 0x61f   :  { %v1835_v48 = vadd.f32 %v2794_v46, %v3671_v8  ;;  %2819 = vmatprep.mubr.bf16.mxu0 %v1858_v44  ;;  %v1850_v24 = vmax.f32 %v1824_v47, 0.0  ;;  %2840 = vmatpush3.bf16.msra.mxu1 %v2954_v61 }
 0x620   :  { %v1826_v21 = vpop.f32.mrf.mxu1  ;;  %2820 = vmatmul.mubr.bf16.gmra.mxu0 %v1859_v45 }
 0x621   :  { %v1827_v22 = vadd.f32 %v3671_v8, %v1826_v21  ;;  %v1853_v23 = vmax.f32 %v1835_v48, 0.0  ;;  %v2955_v8 = vld [vmem:[#allocation17] sm:$0xff]  }
 0x622   :  { %2841 = vmatprep.subr.bf16.mxu1 %v2955_v8 }
 0x623   :  { %v1851_v25 = vmax.f32 %v1827_v22, 0.0  ;;  %v1861_v29 = vpack.c.bf16 %v1853_v23, %v1852_v27  ;;  %2842 = vmatpush3.bf16.msra.mxu1 %v2955_v8 }
 0x625   :  { %v1860_v28 = vpack.c.bf16 %v1851_v25, %v1850_v24  ;;  %v2361_v25 = vld [vmem:[%s3894_s15] ss:$0 sm:$0xff] }
 0x627   :  { %2823 = vmatprep.mubr.bf16.mxu0 %v1860_v28 }
 0x628   :  { %2824 = vmatmul.mubr.bf16.gmra.mxu0 %v1861_v29 }
 0x6b0   :  { %v2749_v20 = vpop.f32.mrf.mxu0 }
 0x6b1   :  { %v1437_v43 = vadd.f32 %v2749_v20, %v2343_v14 }
 0x6b2   :  { %v1428_v34 = vpop.f32.mrf.mxu0 }
 0x6b3   :  { %v1429_v35 = vadd.f32 %v2343_v14, %v1428_v34  ;;  %v3697_v36 = vsel %vm1493_vm0, %v1437_v43, -1e+30 }
 0x6b4   :  { %1514 = vmax.xlane.f32.xlu1 %v3697_v36  ;;  %v2750_v37 = vpop.f32.mrf.mxu0 }
 0x6b5   :  { %v1440_v38 = vadd.f32 %v2750_v37, %v2343_v14  ;;  %v3702_v39 = vsel %vm1493_vm0, %v1429_v35, -1e+30 }
 0x6b6   :  { %v1431_v40 = vpop.f32.mrf.mxu0  ;;  %1510 = vmax.xlane.f32.xlu0 %v3702_v39 }
 0x6b7   :  { %v1432_v41 = vadd.f32 %v2343_v14, %v1431_v40  ;;  %v3707_v42 = vsel %vm1493_vm0, %v1440_v38, -1e+30 }
 0x6b8   :  { %1516 = vmax.xlane.f32.xlu1 %v3707_v42  ;;  %v2753_v50 = vpop.f32.mrf.mxu0 }
 0x6b9   :  { %v1453_v51 = vadd.f32 %v2753_v50, %v2343_v14  ;;  %v3712_v52 = vsel %vm1493_vm0, %v1432_v41, -1e+30 }
 0x6ba   :  { %v1444_v53 = vpop.f32.mrf.mxu0  ;;  %1512 = vmax.xlane.f32.xlu0 %v3712_v52 }
 0x6bb   :  { %v1445_v55 = vadd.f32 %v2343_v14, %v1444_v53  ;;  %v3717_v57 = vsel %vm1493_vm0, %v1453_v51, -1e+30 }
 0x6bc   :  { %v2754_v54 = vpop.f32.mrf.mxu0 }
 0x6bd   :  { %v1456_v56 = vadd.f32 %v2754_v54, %v2343_v14  ;;  %v3727_v1 = vsel %vm1493_vm0, %v1445_v55, -1e+30 }
 0x6be   :  { %v1447_v59 = vpop.f32.mrf.mxu0  ;;  %1522 = vmax.xlane.f32.xlu0 %v3717_v57 }
 0x6bf   :  { %v1448_v60 = vadd.f32 %v2343_v14, %v1447_v59  ;;  %v3722_v62 = vsel %vm1493_vm0, %v1456_v56, -1e+30 }
 0x6c0   :  { %1524 = vmax.xlane.f32.xlu1 %v3722_v62  ;;  %v2757_v63 = vpop.f32.mrf.mxu0 }
 0x6c1   :  { %v1469_v0 = vadd.f32 %v2757_v63, %v2343_v14  ;;  %v3732_v3 = vsel %vm1493_vm0, %v1448_v60, -1e+30 }
 0x6c2   :  { %v1460_v2 = vpop.f32.mrf.mxu0  ;;  %1518 = vmax.xlane.f32.xlu0 %v3727_v1 }
 0x6c3   :  { %v1461_v5 = vadd.f32 %v2343_v14, %v1460_v2  ;;  %v3737_v7 = vsel %vm1493_vm0, %v1469_v0, -1e+30 }
 0x6c4   :  { %v2758_v4 = vpop.f32.mrf.mxu0  ;;  %1520 = vmax.xlane.f32.xlu1 %v3732_v3 }
 0x6c5   :  { %v1472_v6 = vadd.f32 %v2758_v4, %v2343_v14  ;;  %v3747_v15 = vsel %vm1493_vm0, %v1461_v5, -1e+30 }
 0x6c6   :  { %v1463_v9 = vpop.f32.mrf.mxu0  ;;  %1530 = vmax.xlane.f32.xlu0 %v3737_v7 }
 0x6c7   :  { %v1464_v11 = vadd.f32 %v2343_v14, %v1463_v9  ;;  %v3742_v12 = vsel %vm1493_vm0, %v1472_v6, -1e+30 }
 0x6c8   :  { %v2761_v13 = vpop.f32.mrf.mxu0  ;;  %1532 = vmax.xlane.f32.xlu1 %v3742_v12 }
 0x6c9   :  { %v3752_v19 = vsel %vm1493_vm0, %v1464_v11, -1e+30  ;;  %v1485_v45 = vadd.f32 %v2761_v13, %v2343_v14 }
 0x6ca   :  { %v1476_v17 = vpop.f32.mrf.mxu0  ;;  %1526 = vmax.xlane.f32.xlu0 %v3747_v15 }
 0x6cb   :  { %v1477_v18 = vadd.f32 %v2343_v14, %v1476_v17  ;;  %v3766_v23 = vsel %vm1493_vm0, %v1485_v45, -1e+30 }
 0x6cc   :  { %v2762_v44 = vpop.f32.mrf.mxu0  ;;  %1528 = vmax.xlane.f32.xlu1 %v3752_v19 }
 0x6cd   :  { %v3757_v46 = vsel %vm1493_vm0, %v1477_v18, -1e+30  ;;  %v1488_v21 = vadd.f32 %v2762_v44, %v2343_v14 }
 0x6ce   :  { %v1479_v47 = vpop.f32.mrf.mxu0  ;;  %1534 = vmax.xlane.f32.xlu0 %v3757_v46 }
 0x6cf   :  { %v1480_v48 = vadd.f32 %v2343_v14, %v1479_v47  ;;  %v3775_v30 = vsel %vm1493_vm0, %v1488_v21, -1e+30 }
 0x6d0   :  { %v2813_v49 = vpop.f32.mrf.mxu0 }
 0x6d1   :  { %v3762_v22 = vsel %vm1493_vm0, %v1480_v48, -1e+30  ;;  %v1976_v31 = vadd.f32 %v2813_v49, %v2361_v25 }
 0x6d2   :  { %v1967_v24 = vpop.f32.mrf.mxu0  ;;  %1536 = vmax.xlane.f32.xlu1 %v3762_v22  ;;  %1538 = vmax.xlane.f32.xlu0 %v3766_v23 }
 0x6d3   :  { %v1968_v28 = vadd.f32 %v2361_v25, %v1967_v24  ;;  %v2032_v10 = vmax.f32 %v1976_v31, 0.0 }
 0x6d4   :  { %v2814_v27 = vpop.f32.mrf.mxu0 }
 0x6d5   :  { %v1979_v29 = vadd.f32 %v2814_v27, %v2361_v25  ;;  %v2030_v61 = vmax.f32 %v1968_v28, 0.0 }
 0x6d6   :  { %v1970_v32 = vpop.f32.mrf.mxu0  ;;  %1540 = vmax.xlane.f32.xlu1 %v3775_v30 }
 0x6d7   :  { %v1971_v26 = vadd.f32 %v2361_v25, %v1970_v32  ;;  %v2033_v58 = vmax.f32 %v1979_v29, 0.0 }
 0x6d8   :  { %v2817_v33 = vpop.f32.mrf.mxu0 }
 0x6d9   :  { %v2031_v8 = vmax.f32 %v1971_v26, 0.0  ;;  %v2047_v43 = vpack.c.bf16 %v2033_v58, %v2032_v10  ;;  %v1992_v16 = vadd.f32 %v2817_v33, %v2361_v25 }
 0x6da   :  { %v1983_v14 = vpop.f32.mrf.mxu0 }
 0x6db   :  { %v2046_v20 = vpack.c.bf16 %v2031_v8, %v2030_v61  ;;  %v1984_v35 = vadd.f32 %v2361_v25, %v1983_v14  ;;  %v2036_v54 = vmax.f32 %v1992_v16, 0.0 }
 0x6dc   :  { %v2818_v34 = vpop.f32.mrf.mxu0 }
 0x6dd   :  { %v1995_v37 = vadd.f32 %v2818_v34, %v2361_v25  ;;  %2843 = vmatprep.mubr.bf16.mxu1 %v2046_v20  ;;  %v2034_v51 = vmax.f32 %v1984_v35, 0.0 }
 0x6de   :  { %v1986_v38 = vpop.f32.mrf.mxu0  ;;  %2844 = vmatmul.mubr.bf16.vlgmr.msra.gmra.mxu1 %v2047_v43 }
 0x6df   :  { %v1987_v40 = vadd.f32 %v2361_v25, %v1986_v38  ;;  %v2037_v41 = vmax.f32 %v1995_v37, 0.0 }
 0x6e0   :  { %v2821_v50 = vpop.f32.mrf.mxu0 }
 0x6e1   :  { %v2035_v53 = vmax.f32 %v1987_v40, 0.0  ;;  %v2049_v59 = vpack.c.bf16 %v2037_v41, %v2036_v54  ;;  %v2008_v2 = vadd.f32 %v2821_v50, %v2361_v25 }
 0x6e2   :  { %v1999_v55 = vpop.f32.mrf.mxu0 }
 0x6e3   :  { %v2048_v56 = vpack.c.bf16 %v2035_v53, %v2034_v51  ;;  %v2000_v63 = vadd.f32 %v2361_v25, %v1999_v55  ;;  %v2040_v17 = vmax.f32 %v2008_v2, 0.0 }
 0x6e4   :  { %v2822_v60 = vpop.f32.mrf.mxu0 }
 0x6e5   :  { %v2011_v0 = vadd.f32 %v2822_v60, %v2361_v25  ;;  %2847 = vmatprep.mubr.bf16.mxu1 %v2048_v56  ;;  %v2038_v11 = vmax.f32 %v2000_v63, 0.0 }
 0x6e6   :  { %v2002_v4 = vpop.f32.mrf.mxu0  ;;  %2848 = vmatmul.mubr.bf16.gmra.mxu1 %v2049_v59 }
 0x6e7   :  { %v2003_v5 = vadd.f32 %v2361_v25, %v2002_v4  ;;  %v2041_v6 = vmax.f32 %v2011_v0, 0.0 }
 0x6e8   :  { %v2825_v9 = vpop.f32.mrf.mxu0 }
 0x6e9   :  { %v2039_v13 = vmax.f32 %v2003_v5, 0.0  ;;  %v2051_v45 = vpack.c.bf16 %v2041_v6, %v2040_v17  ;;  %v2024_v21 = vadd.f32 %v2825_v9, %v2361_v25 }
 0x6ea   :  { %v2015_v18 = vpop.f32.mrf.mxu0 }
 0x6eb   :  { %v2050_v44 = vpack.c.bf16 %v2039_v13, %v2038_v11  ;;  %v2016_v48 = vadd.f32 %v2361_v25, %v2015_v18  ;;  %v2044_v32 = vmax.f32 %v2024_v21, 0.0 }
 0x6ec   :  { %v2826_v47 = vpop.f32.mrf.mxu0 }
 0x6ed   :  { %v2027_v49 = vadd.f32 %v2826_v47, %v2361_v25  ;;  %2851 = vmatprep.mubr.bf16.mxu1 %v2050_v44  ;;  %v2042_v29 = vmax.f32 %v2016_v48, 0.0 }
 0x6ee   :  { %v2018_v24 = vpop.f32.mrf.mxu0  ;;  %2852 = vmatmul.mubr.bf16.gmra.mxu1 %v2051_v45 }
 0x6ef   :  { %v2019_v27 = vadd.f32 %v2361_v25, %v2018_v24  ;;  %v2045_v28 = vmax.f32 %v2027_v49, 0.0 }
 0x6f1   :  { %v2043_v31 = vmax.f32 %v2019_v27, 0.0  ;;  %v2053_v58 = vpack.c.bf16 %v2045_v28, %v2044_v32 }
 0x6f3   :  { %v2052_v26 = vpack.c.bf16 %v2043_v31, %v2042_v29 }
 0x6f5   :  { %2855 = vmatprep.mubr.bf16.mxu1 %v2052_v26 }
 0x6f6   :  { %2856 = vmatmul.mubr.bf16.gmra.mxu1 %v2053_v58 }
 0x73d   :  { %v1515_v33 = vpop.xlane.xlu1 %1514 }
 0x73e   :  { %v1544_v61 = vsub.f32 %v3697_v36, %v1515_v33  ;;  %v2370_v33 = vld [vmem:[%s3896_s17] ss:$0 sm:$0xff]  ;;  %s3372_s17 = smov [#allocation20]  }
 0x73f   :  { %v1511_v8 = vpop.xlane.xlu0 %1510  ;;  %s2255_s22 = sshll.u32 %s3372_s17, 4  ;;  %s2256_s22 = int_to_ptr.vmem [resolvable:$true] %s2255_s22 }
 0x740   :  { %v1562_v10 = vmul.f32 1.442695, %v1544_v61  ;;  %v1542_v14 = vsub.f32 %v3702_v39, %v1511_v8  ;;  %s3284_s26 = scalar_lea.vmem %s2256_s22, 2048  ;;  %p3289_p9 = scmp.lt.s32.totalorder %s2256_s22, %s2256_s22 }
 0x741   :  { %v1517_v20 = vpop.xlane.xlu1 %1516  ;;  %p3285_p8 = scmp.ne.s32.totalorder %s2256_s22, %s3284_s26  ;;  %p3290_p10 = scmp.lt.s32.totalorder %s3284_s26, %s3284_s26 }
 0x742   :  { %3020 = vpow2.f32 %v1562_v10  ;;  %v1558_v43 = vmul.f32 1.442695, %v1542_v14  ;;  %v1545_v25 = vsub.f32 %v3707_v42, %v1517_v20 }
 0x743   :  { %v1513_v34 = vpop.xlane.xlu0 %1512  ;;  %p3291_p11 = por %p3290_p10, %p3289_p9 }
 0x744   :  { %v1564_v35 = vmul.f32 1.442695, %v1545_v25  ;;  %v1543_v37 = vsub.f32 %v3712_v52, %v1513_v34  ;;  %3022 = vpow2.f32 %v1558_v43 }
 0x745   :  { %p3292_p12 = pnand %p3291_p11, %p3285_p8 }
 0x746   :  { %3024 = vpow2.f32 %v1564_v35  ;;  %v1560_v16 = vmul.f32 1.442695, %v1543_v37 }
 0x747   :  { %v1523_v38 = vpop.xlane.xlu0 %1522 }
 0x748   :  { %v1548_v40 = vsub.f32 %v3717_v57, %v1523_v38  ;;  %3026 = vpow2.f32 %v1560_v16 }
 0x749   :  { %v1525_v36 = vpop.xlane.xlu1 %1524 }
 0x74a   :  { %v1570_v41 = vmul.f32 1.442695, %v1548_v40  ;;  %v1549_v39 = vsub.f32 %v3722_v62, %v1525_v36 }
 0x74b   :  { %v1519_v50 = vpop.xlane.xlu0 %1518 }
 0x74c   :  { %3028 = vpow2.f32 %v1570_v41  ;;  %v1572_v51 = vmul.f32 1.442695, %v1549_v39  ;;  %v1546_v42 = vsub.f32 %v3727_v1, %v1519_v50 }
 0x74d   :  { %v1521_v53 = vpop.xlane.xlu1 %1520 }
 0x74e   :  { %3030 = vpow2.f32 %v1572_v51  ;;  %v1566_v54 = vmul.f32 1.442695, %v1546_v42  ;;  %v1547_v52 = vsub.f32 %v3732_v3, %v1521_v53 }
 0x74f   :  { %v3786_v55 = vpop.eup %3020  ;;  %v1531_v56 = vpop.xlane.xlu0 %1530 }
 0x750   :  { %3032 = vpow2.f32 %v1566_v54  ;;  %v1568_v57 = vmul.f32 1.442695, %v1547_v52  ;;  %v1552_v59 = vsub.f32 %v3737_v7, %v1531_v56  ;;  %1594 = vadd.xlane.f32.xlu0 %v3786_v55 }
 0x751   :  { %v1533_v62 = vpop.xlane.xlu1 %1532  ;;  %v3790_v60 = vpop.eup %3022 }
 0x752   :  { %3034 = vpow2.f32 %v1568_v57  ;;  %v1578_v63 = vmul.f32 1.442695, %v1552_v59  ;;  %v1553_v1 = vsub.f32 %v3742_v12, %v1533_v62 }
 0x753   :  { %v3793_v0 = vpop.eup %3024  ;;  %v1527_v2 = vpop.xlane.xlu0 %1526 }
 0x754   :  { %3036 = vpow2.f32 %v1578_v63  ;;  %v1580_v3 = vmul.f32 1.442695, %v1553_v1  ;;  %v1550_v4 = vsub.f32 %v3747_v15, %v1527_v2  ;;  %1596 = vadd.xlane.f32.xlu1 %v3793_v0  ;;  %1590 = vadd.xlane.f32.xlu0 %v3790_v60 }
 0x755   :  { %v1529_v7 = vpop.xlane.xlu1 %1528  ;;  %v3799_v9 = vpop.eup %3026 }
 0x756   :  { %3038 = vpow2.f32 %v1580_v3  ;;  %v1574_v5 = vmul.f32 1.442695, %v1550_v4  ;;  %v1551_v6 = vsub.f32 %v3752_v19, %v1529_v7 }
 0x757   :  { %v1535_v11 = vpop.xlane.xlu0 %1534 }
 0x758   :  { %3040 = vpow2.f32 %v1574_v5  ;;  %v1576_v12 = vmul.f32 1.442695, %v1551_v6  ;;  %v1554_v13 = vsub.f32 %v3757_v46, %v1535_v11  ;;  %1592 = vadd.xlane.f32.xlu1 %v3799_v9 }
 0x759   :  { %v3803_v17 = vpop.eup %3028 }
 0x75a   :  { %3042 = vpow2.f32 %v1576_v12  ;;  %v1582_v15 = vmul.f32 1.442695, %v1554_v13  ;;  %1602 = vadd.xlane.f32.xlu0 %v3803_v17 }
 0x75b   :  { %v3806_v18 = vpop.eup %3030  ;;  %v1537_v44 = vpop.xlane.xlu1 %1536 }
 0x75c   :  { %v1539_v45 = vpop.xlane.xlu0 %1538  ;;  %3044 = vpow2.f32 %v1582_v15  ;;  %v1555_v19 = vsub.f32 %v3762_v22, %v1537_v44  ;;  %1604 = vadd.xlane.f32.xlu1 %v3806_v18 }
 0x75d   :  { %v1556_v47 = vsub.f32 %v3766_v23, %v1539_v45  ;;  %v3811_v46 = vpop.eup %3032 }
 0x75e   :  { %v1584_v48 = vmul.f32 1.442695, %v1555_v19  ;;  %1598 = vadd.xlane.f32.xlu0 %v3811_v46 }
 0x75f   :  { %v1586_v49 = vmul.f32 1.442695, %v1556_v47  ;;  %v3814_v21 = vpop.eup %3034  ;;  %v1541_v24 = vpop.xlane.xlu1 %1540 }
 0x760   :  { %3046 = vpow2.f32 %v1584_v48  ;;  %v1557_v27 = vsub.f32 %v3775_v30, %v1541_v24  ;;  %1600 = vadd.xlane.f32.xlu1 %v3814_v21 }
 0x761   :  { %v3818_v28 = vpop.eup %3036  ;;  %3048 = vpow2.f32 %v1586_v49 }
 0x762   :  { %v1588_v22 = vmul.f32 1.442695, %v1557_v27  ;;  %1610 = vadd.xlane.f32.xlu0 %v3818_v28 }
 0x763   :  { %v3821_v23 = vpop.eup %3038 }
 0x764   :  { %3050 = vpow2.f32 %v1588_v22  ;;  %1612 = vadd.xlane.f32.xlu1 %v3821_v23 }
 0x765   :  { %v3824_v29 = vpop.eup %3040 }
 0x766   :  { %1606 = vadd.xlane.f32.xlu0 %v3824_v29 }
 0x767   :  { %v3827_v31 = vpop.eup %3042 }
 0x768   :  { %1608 = vadd.xlane.f32.xlu1 %v3827_v31 }
 0x769   :  { %v3830_v30 = vpop.eup %3044 }
 0x76a   :  { %1614 = vadd.xlane.f32.xlu0 %v3830_v30 }
 0x76d   :  { %v3833_v32 = vpop.eup %3046 }
 0x76e   :  { %v3835_v26 = vpop.eup %3048  ;;  %1616 = vadd.xlane.f32.xlu1 %v3833_v32 }
 0x76f   :  { %1618 = vadd.xlane.f32.xlu0 %v3835_v26 }
 0x771   :  { %v3839_v58 = vpop.eup %3050 }
 0x772   :  { %1620 = vadd.xlane.f32.xlu1 %v3839_v58 }
 0x79e   :  { %v2845_v61 = vpop.f32.mrf.mxu1 }
 0x79f   :  { %v2168_v8 = vadd.f32 %v2845_v61, %v2370_v33 }
 0x7a0   :  { %v2159_v10 = vpop.f32.mrf.mxu1 }
 0x7a1   :  { %2224 = vst [vmem:[#allocation20 + $0x10] sm:$0xff] %v2168_v8  ;;  %v2160_v14 = vadd.f32 %v2370_v33, %v2159_v10 }
 0x7a2   :  { %v2846_v20 = vpop.f32.mrf.mxu1 }
 0x7a3   :  { %2222 = vst [vmem:[#allocation20] sm:$0xff] %v2160_v14  ;;  %v2171_v43 = vadd.f32 %v2846_v20, %v2370_v33 }
 0x7a4   :  { %v2162_v25 = vpop.f32.mrf.mxu1 }
 0x7a5   :  { %2225 = vst [vmem:[#allocation20 + $0x18] sm:$0xff] %v2171_v43  ;;  %v2163_v34 = vadd.f32 %v2370_v33, %v2162_v25 }
 0x7a6   :  { %v2849_v35 = vpop.f32.mrf.mxu1 }
 0x7a7   :  { %2223 = vst [vmem:[#allocation20 + $0x8] sm:$0xff] %v2163_v34  ;;  %v2184_v37 = vadd.f32 %v2849_v35, %v2370_v33 }
 0x7a8   :  { %v2175_v16 = vpop.f32.mrf.mxu1 }
 0x7a9   :  { %2228 = vst [vmem:[#allocation20 + $0x30] sm:$0xff] %v2184_v37  ;;  %v2176_v38 = vadd.f32 %v2370_v33, %v2175_v16 }
 0x7aa   :  { %v2850_v40 = vpop.f32.mrf.mxu1 }
 0x7ab   :  { %2226 = vst [vmem:[#allocation20 + $0x20] sm:$0xff] %v2176_v38  ;;  %v2187_v36 = vadd.f32 %v2850_v40, %v2370_v33 }
 0x7ac   :  { %v2178_v41 = vpop.f32.mrf.mxu1 }
 0x7ad   :  { %2229 = vst [vmem:[#allocation20 + $0x38] sm:$0xff] %v2187_v36  ;;  %v2179_v39 = vadd.f32 %v2370_v33, %v2178_v41 }
 0x7ae   :  { %v2853_v50 = vpop.f32.mrf.mxu1 }
 0x7af   :  { %2227 = vst [vmem:[#allocation20 + $0x28] sm:$0xff] %v2179_v39  ;;  %v2200_v51 = vadd.f32 %v2853_v50, %v2370_v33 }
 0x7b0   :  { %v2191_v42 = vpop.f32.mrf.mxu1 }
 0x7b1   :  { %2232 = vst [vmem:[#allocation20 + $0x50] sm:$0xff] %v2200_v51  ;;  %v2192_v53 = vadd.f32 %v2370_v33, %v2191_v42 }
 0x7b2   :  { %v2854_v54 = vpop.f32.mrf.mxu1 }
 0x7b3   :  { %2230 = vst [vmem:[#allocation20 + $0x40] sm:$0xff] %v2192_v53  ;;  %v2203_v52 = vadd.f32 %v2854_v54, %v2370_v33 }
 0x7b4   :  { %v2194_v56 = vpop.f32.mrf.mxu1 }
 0x7b5   :  { %2233 = vst [vmem:[#allocation20 + $0x58] sm:$0xff] %v2203_v52  ;;  %v2195_v57 = vadd.f32 %v2370_v33, %v2194_v56 }
 0x7b6   :  { %v2857_v59 = vpop.f32.mrf.mxu1 }
 0x7b7   :  { %2231 = vst [vmem:[#allocation20 + $0x48] sm:$0xff] %v2195_v57  ;;  %v2216_v62 = vadd.f32 %v2857_v59, %v2370_v33 }
 0x7b8   :  { %v2207_v63 = vpop.f32.mrf.mxu1 }
 0x7b9   :  { %2236 = vst [vmem:[#allocation20 + $0x70] sm:$0xff] %v2216_v62  ;;  %v2208_v1 = vadd.f32 %v2370_v33, %v2207_v63 }
 0x7ba   :  { %v2858_v2 = vpop.f32.mrf.mxu1 }
 0x7bb   :  { %2234 = vst [vmem:[#allocation20 + $0x60] sm:$0xff] %v2208_v1  ;;  %v2219_v3 = vadd.f32 %v2858_v2, %v2370_v33 }
 0x7bc   :  { %v2210_v4 = vpop.f32.mrf.mxu1 }
 0x7bd   :  { %2237 = vst [vmem:[#allocation20 + $0x78] sm:$0xff] %v2219_v3  ;;  %v2211_v7 = vadd.f32 %v2370_v33, %v2210_v4 }
 0x7bf   :  { %2235 = vst [vmem:[#allocation20 + $0x68] sm:$0xff] %v2211_v7 }
 0x7c0   :  { %3295 = shalt.err (!%p3292_p12)
}
 0x7c1   :  { %s3374_s6 = smov 128   ;;  %s3375_s27 = smov 8  }
 0x7c2   :  { %2261 = dma.vmem_to_hbm [thread:$0]  %s2256_s22, 2048, %s3898_s19, [#allocation21], %s3374_s6, %s3374_s6, %s3375_s27  }
 0x7c3   :  { %s3304_s28 = scalar_lea.vmem %s2268_s2, 2048  ;;  %p3309_p0 = scmp.lt.s32.totalorder %s2268_s2, %s2268_s2 }
 0x7c4   :  { %p3305_p13 = scmp.ne.s32.totalorder %s2268_s2, %s3304_s28  ;;  %p3310_p1 = scmp.lt.s32.totalorder %s3304_s28, %s3304_s28 }
 0x7c6   :  { %p3311_p2 = por %p3310_p1, %p3309_p0 }
 0x7c8   :  { %p3312_p3 = pnand %p3311_p2, %p3305_p13 }
 0x7ca   :  { %3315 = shalt.err (!%p3312_p3)
}
 0x7cb   :  { %2273 = dma.vmem_to_hbm [thread:$0]  %s2268_s2, 2048, %s3899_s20, [#allocation21], %s3374_s6, %s3374_s6, %s3375_s27  }
 0x7cc   :  { %s3376_s19 = smov [#allocation19]  }
 0x7cd   :  { %s2243_s20 = sshll.u32 %s3376_s19, 4  ;;  %s2244_s20 = int_to_ptr.vmem [resolvable:$true] %s2243_s20 }
 0x7ce   :  { %s3324_s16 = scalar_lea.vmem %s2244_s20, 2048  ;;  %p3329_p5 = scmp.lt.s32.totalorder %s2244_s20, %s2244_s20 }
 0x7cf   :  { %p3325_p4 = scmp.ne.s32.totalorder %s2244_s20, %s3324_s16  ;;  %p3330_p6 = scmp.lt.s32.totalorder %s3324_s16, %s3324_s16 }
 0x7d1   :  { %p3331_p7 = por %p3330_p6, %p3329_p5 }
 0x7d3   :  { %p3332_p8 = pnand %p3331_p7, %p3325_p4 }
 0x7d9   :  { %v1595_v5 = vpop.xlane.xlu0 %1594 }
 0x7da   :  { %3052 = vrcp.f32 %v1595_v5 }
 0x7dd   :  { %v1597_v6 = vpop.xlane.xlu1 %1596  ;;  %v1591_v11 = vpop.xlane.xlu0 %1590 }
 0x7de   :  { %3054 = vrcp.f32 %v1597_v6 }
 0x7df   :  { %3056 = vrcp.f32 %v1591_v11 }
 0x7e1   :  { %v1593_v12 = vpop.xlane.xlu1 %1592 }
 0x7e2   :  { %3058 = vrcp.f32 %v1593_v12 }
 0x7e3   :  { %v1603_v13 = vpop.xlane.xlu0 %1602 }
 0x7e4   :  { %3060 = vrcp.f32 %v1603_v13 }
 0x7e5   :  { %v1605_v15 = vpop.xlane.xlu1 %1604 }
 0x7e6   :  { %3062 = vrcp.f32 %v1605_v15 }
 0x7e7   :  { %v3053_v44 = vpop.eup %3052  ;;  %v1599_v45 = vpop.xlane.xlu0 %1598 }
 0x7e8   :  { %v1640_v19 = vmul.f32 %v3053_v44, %v3786_v55  ;;  %3064 = vrcp.f32 %v1599_v45 }
 0x7e9   :  { %v1601_v47 = vpop.xlane.xlu1 %1600 }
 0x7ea   :  { %1656 = vst [vmem:[#allocation19 + $0x10] sm:$0xff] %v1640_v19  ;;  %3066 = vrcp.f32 %v1601_v47 }
 0x7eb   :  { %v3055_v48 = vpop.eup %3054  ;;  %v1611_v49 = vpop.xlane.xlu0 %1610 }
 0x7ec   :  { %v3057_v24 = vpop.eup %3056  ;;  %v1641_v27 = vmul.f32 %v3055_v48, %v3793_v0  ;;  %3068 = vrcp.f32 %v1611_v49 }
 0x7ed   :  { %v1638_v22 = vmul.f32 %v3057_v24, %v3790_v60  ;;  %v1613_v33 = vpop.xlane.xlu1 %1612 }
 0x7ee   :  { %1657 = vst [vmem:[#allocation19 + $0x18] sm:$0xff] %v1641_v27  ;;  %3070 = vrcp.f32 %v1613_v33 }
 0x7ef   :  { %v3059_v61 = vpop.eup %3058  ;;  %1654 = vst [vmem:[#allocation19] sm:$0xff] %v1638_v22  ;;  %v1607_v8 = vpop.xlane.xlu0 %1606 }
 0x7f0   :  { %v1639_v55 = vmul.f32 %v3059_v61, %v3799_v9  ;;  %3072 = vrcp.f32 %v1607_v8 }
 0x7f1   :  { %v3061_v10 = vpop.eup %3060  ;;  %v1609_v14 = vpop.xlane.xlu1 %1608 }
 0x7f2   :  { %1655 = vst [vmem:[#allocation19 + $0x8] sm:$0xff] %v1639_v55  ;;  %v1644_v20 = vmul.f32 %v3061_v10, %v3803_v17  ;;  %3074 = vrcp.f32 %v1609_v14 }
 0x7f3   :  { %v3063_v43 = vpop.eup %3062  ;;  %v1615_v0 = vpop.xlane.xlu0 %1614 }
 0x7f4   :  { %1660 = vst [vmem:[#allocation19 + $0x30] sm:$0xff] %v1644_v20  ;;  %v1645_v60 = vmul.f32 %v3063_v43, %v3806_v18  ;;  %3076 = vrcp.f32 %v1615_v0 }
 0x7f5   :  { %v3065_v25 = vpop.eup %3064 }
 0x7f6   :  { %1661 = vst [vmem:[#allocation19 + $0x38] sm:$0xff] %v1645_v60  ;;  %v1642_v34 = vmul.f32 %v3065_v25, %v3811_v46 }
 0x7f7   :  { %v3067_v35 = vpop.eup %3066  ;;  %v1617_v37 = vpop.xlane.xlu1 %1616 }
 0x7f8   :  { %1658 = vst [vmem:[#allocation19 + $0x20] sm:$0xff] %v1642_v34  ;;  %v1643_v9 = vmul.f32 %v3067_v35, %v3814_v21  ;;  %3078 = vrcp.f32 %v1617_v37  ;;  %v1619_v16 = vpop.xlane.xlu0 %1618 }
 0x7f9   :  { %v3069_v38 = vpop.eup %3068  ;;  %3080 = vrcp.f32 %v1619_v16 }
 0x7fa   :  { %1659 = vst [vmem:[#allocation19 + $0x28] sm:$0xff] %v1643_v9  ;;  %v1648_v17 = vmul.f32 %v3069_v38, %v3818_v28 }
 0x7fb   :  { %v3071_v40 = vpop.eup %3070  ;;  %v1621_v36 = vpop.xlane.xlu1 %1620 }
 0x7fc   :  { %1664 = vst [vmem:[#allocation19 + $0x50] sm:$0xff] %v1648_v17  ;;  %v1649_v18 = vmul.f32 %v3071_v40, %v3821_v23  ;;  %3082 = vrcp.f32 %v1621_v36 }
 0x7fd   :  { %v3073_v41 = vpop.eup %3072 }
 0x7fe   :  { %1665 = vst [vmem:[#allocation19 + $0x58] sm:$0xff] %v1649_v18  ;;  %v1646_v46 = vmul.f32 %v3073_v41, %v3824_v29 }
 0x7ff   :  { %v3075_v39 = vpop.eup %3074 }
 0x800   :  { %1662 = vst [vmem:[#allocation19 + $0x40] sm:$0xff] %v1646_v46  ;;  %v1647_v21 = vmul.f32 %v3075_v39, %v3827_v31 }
 0x801   :  { %v3077_v50 = vpop.eup %3076 }
 0x802   :  { %1663 = vst [vmem:[#allocation19 + $0x48] sm:$0xff] %v1647_v21  ;;  %v1650_v51 = vmul.f32 %v3077_v50, %v3830_v30 }
 0x804   :  { %1666 = vst [vmem:[#allocation19 + $0x60] sm:$0xff] %v1650_v51 }
 0x805   :  { %v3079_v28 = vpop.eup %3078 }
 0x806   :  { %v3081_v42 = vpop.eup %3080  ;;  %v1651_v53 = vmul.f32 %v3079_v28, %v3833_v32 }
 0x807   :  { %v1652_v23 = vmul.f32 %v3081_v42, %v3835_v26 }
 0x808   :  { %1667 = vst [vmem:[#allocation19 + $0x68] sm:$0xff] %v1651_v53 }
 0x809   :  { %v3083_v54 = vpop.eup %3082  ;;  %1668 = vst [vmem:[#allocation19 + $0x70] sm:$0xff] %v1652_v23 }
 0x80a   :  { %v1653_v29 = vmul.f32 %v3083_v54, %v3839_v58 }
 0x80c   :  { %1669 = vst [vmem:[#allocation19 + $0x78] sm:$0xff] %v1653_v29 }
 0x80d   :  { %3335 = shalt.err (!%p3332_p8)
}
 0x80e   :  { %2249 = dma.vmem_to_hbm [thread:$0]  %s2244_s20, 2048, %s3897_s18, [#allocation4], %s3374_s6, %s3374_s6, %s3375_s27  }
 0x80f   :  { %3356 = dma.done.wait [#allocation4], 2048  }
 0x810   :  { %3357 = vsyncadd [#allocation4], 4294965248 }
 0x811   :  { %3358 = dma.done.wait [#allocation21], 4096  }
 0x812   :  { %3359 = vsyncadd [#allocation21], 4294963200 }
 0x813   :  { %2283 = vsyncpa [#allocation3], 1 }
 0x814   :  { %2284 = vsyncpa [#allocation6], 1 }
 0x815   :  { %2285 = vsyncpa [#allocation9], 1 }
 0x816   :  { %2286 = vsyncpa [#allocation12], 1 }
 0x817   :  { %2287 = vsyncpa [#allocation15], 1 }
 0x818   :  { %2288 = vsyncpa [#allocation18], 1 }
 0x819   :  { %2289 = vsyncpa [#allocation4], 1 }
 0x81a   :  { %2290 = vsyncpa [#allocation21], 1 }

</bundles_post_ra>
